<compile_context>
chip_gen: v7x
topology: tpu7x:2x2x1
jax: 0.10.0
libtpu: 0.0.40
codegen_flags: <defaults>
</compile_context>

<pallas_src>
import functools

import jax
import jax.numpy as jnp
from jax.experimental import pallas as pl
from jax.experimental.pallas import tpu as pltpu


# ------------------------------- kernel ---------------------------------------


def _fused_graphsage_kernel(*refs, layer_meta, eps=1e-5):
    """Entire GraphSAGE forward, fully VMEM-resident.

    refs = (a01_ref, inv_deg_ref, feat_ref, *param_refs, o_ref)

    a01_ref    : [N, N] binary adjacency (0/1) in the compute dtype.
    inv_deg_ref: [N, 1] f32, 1 / clamp(in_degree, 1).
    layer_meta : static tuple of (kind, f_in, f_out, norm_act) per layer with
                 kind in {"sage", "linear"}.  Per-layer params (in order):
                   sage   -> (w_self [f_in,f_out], w_neigh [f_in,f_out], b [1,f_out])
                   linear -> (w [f_in,f_out], b [1,f_out])
                 followed by (gamma, beta) when norm_act is True.
    """
    a_ref, inv_deg_ref, feat_ref, *param_refs, o_ref = refs
    a = a_ref[...]                                   # [N, N] 0/1, compute dtype
    compute_dtype = a.dtype
    inv_deg = inv_deg_ref[...]                       # [N, 1] f32
    h32 = feat_ref[...].astype(jnp.float32)

    p = 0
    for kind, f_in, f_out, norm_act in layer_meta:
        h = h32.astype(compute_dtype)                # bf16 (or f32) MXU operands
        if kind == "sage":
            ws_ref, wn_ref, b_ref = param_refs[p], param_refs[p + 1], param_refs[p + 2]
            p += 3
            # Two dots + VPU add: no lane-dim concat, no mid-tile lane slices.
            self_term = jnp.dot(h, ws_ref[...], preferred_element_type=jnp.float32)
            if f_out < f_in:
                # Project first, aggregate the narrower operand; the f32 row
                # scaling by inv_deg commutes with the right-multiplication.
                pn = jnp.dot(h, wn_ref[...], preferred_element_type=jnp.float32)
                neigh = jnp.dot(a, pn.astype(compute_dtype),
                                preferred_element_type=jnp.float32) * inv_deg
            else:
                agg = jnp.dot(a, h, preferred_element_type=jnp.float32) * inv_deg
                neigh = jnp.dot(agg.astype(compute_dtype), wn_ref[...],
                                preferred_element_type=jnp.float32)
            out = self_term + neigh + b_ref[...]
        else:  # "linear"
            w_ref, b_ref = param_refs[p], param_refs[p + 1]
            p += 2
            out = jnp.dot(h, w_ref[...], preferred_element_type=jnp.float32) + b_ref[...]

        if norm_act:  # LayerNorm (elementwise_affine=True) + ReLU, fused in f32
            gamma_ref, beta_ref = param_refs[p], param_refs[p + 1]
            p += 2
            mean = jnp.mean(out, axis=-1, keepdims=True)
            var = jnp.mean((out - mean) ** 2, axis=-1, keepdims=True)
            out = (out - mean) * jax.lax.rsqrt(var + eps)      # rsqrt -> EUP slot
            out = out * gamma_ref[...] + beta_ref[...]
            out = jnp.maximum(out, 0.0)                        # activation = relu
        h32 = out

    # Lane-dense final store: pad the narrow feature dim up to the output's
    # 128-lane multiple so the HBM writeback is an unmasked vst.
    n_rows, f_last = h32.shape
    f_pad = o_ref.shape[-1]
    if f_pad != f_last:
        h32 = jnp.concatenate(
            [h32, jnp.zeros((n_rows, f_pad - f_last), h32.dtype)], axis=-1)
    o_ref[...] = h32.astype(o_ref.dtype)


# --------------------------- VMEM accounting ----------------------------------


def _vmem_tile_bytes(shape, dtype):
    """Approximate VMEM footprint of an array incl. (8,128) tile padding."""
    shape = tuple(int(d) for d in shape)
    if len(shape) == 0:
        shape = (1, 1)
    elif len(shape) == 1:
        shape = (1, shape[0])
    lead = 1
    for d in shape[:-2]:
        lead *= d
    r = ((shape[-2] + 7) // 8) * 8
    c = ((shape[-1] + 127) // 128) * 128
    return lead * r * c * jnp.dtype(dtype).itemsize


def _physical_vmem_bytes():
    try:
        return int(pltpu.get_tpu_info().vmem_capacity_bytes)
    except Exception:
        return 64 * 1024 * 1024   # conservative floor: v7x has 64 MiB per TensorCore


# ------------------------------- wrapper ---------------------------------------


def prepare_graphsage_operands(params, adj01, *, compute_dtype=jnp.bfloat16):
    """One-time conversion of the O(N^2) adjacency and the layer weights to the
    kernel compute dtype -- hoisted out of the forward so the astype HBM
    round-trip of A (and the weight casts) is not paid per launch."""
    a_lp = adj01.astype(compute_dtype)
    n_layers = len(params)
    flat, meta = [], []
    for i, prm in enumerate(params):
        norm_act = i < n_layers - 1
        if prm["kind"] == "sage":
            f_in, f_out = prm["w_self"].shape
            flat += [prm["w_self"].astype(compute_dtype),
                     prm["w_neigh"].astype(compute_dtype),
                     prm["b"]]
            meta.append(("sage", int(f_in), int(f_out), norm_act))
        else:
            f_in, f_out = prm["w"].shape
            flat += [prm["w"].astype(compute_dtype), prm["b"]]
            meta.append(("linear", int(f_in), int(f_out), norm_act))
        if norm_act:
            flat += [prm["gamma"], prm["beta"]]
    return a_lp, tuple(flat), tuple(meta)


def graphsage_forward(a01, inv_deg, feat, flat_params, layer_meta, *, eps=1e-5):
    """Single fused pallas_call: all operands resident in VMEM, one HBM store."""
    n = feat.shape[0]
    f_final = layer_meta[-1][2]
    f_pad = ((f_final + 127) // 128) * 128           # lane-dense final store

    # Real VMEM footprint: operands (with tile padding) + live f32 intermediates
    # (h32, h, self/agg/neigh, out per layer ~ 6 x [N, max_f]) + headroom.
    operand_bytes = (_vmem_tile_bytes(a01.shape, a01.dtype)
                     + _vmem_tile_bytes(inv_deg.shape, inv_deg.dtype)
                     + _vmem_tile_bytes(feat.shape, feat.dtype)
                     + sum(_vmem_tile_bytes(x.shape, x.dtype) for x in flat_params)
                     + _vmem_tile_bytes((n, f_pad), jnp.float32))
    max_f = max(max(m[1], m[2]) for m in layer_meta)
    intermediate_bytes = 6 * _vmem_tile_bytes((n, max_f), jnp.float32)
    budget = int(1.25 * (operand_bytes + intermediate_bytes)) + (4 << 20)

    physical = _physical_vmem_bytes()
    if budget > physical:
        raise ValueError(
            f"graph too large for the fused VMEM-resident kernel "
            f"(need ~{budget >> 20} MiB, chip has {physical >> 20} MiB/core); "
            f"use the tiled per-layer path (see TODO at top of file).")
    vmem_limit = min(physical, max(budget, 32 * 1024 * 1024))

    kernel = functools.partial(_fused_graphsage_kernel,
                               layer_meta=layer_meta, eps=eps)
    vmem = pl.BlockSpec(memory_space=pltpu.MemorySpace.VMEM)
    out_padded = pl.pallas_call(
        kernel,
        out_shape=jax.ShapeDtypeStruct((n, f_pad), jnp.float32),
        in_specs=[vmem] * (3 + len(flat_params)),
        out_specs=vmem,
        compiler_params=pltpu.CompilerParams(vmem_limit_bytes=vmem_limit),
    )(a01, inv_deg, feat, *flat_params)
    return out_padded[:, :f_final]


# --------------------------- model definition ----------------------------------


def init_graphsage_params(key, layer_size, n_linear):
    """Deterministic synthetic parameters mirroring GraphSAGE.__init__ shapes."""
    n_layers = len(layer_size) - 1
    params = []
    for i in range(n_layers):
        f_in, f_out = layer_size[i], layer_size[i + 1]
        key, k1, k2, k3 = jax.random.split(key, 4)
        scale = 1.0 / jnp.sqrt(f_in)
        if i < n_layers - n_linear:   # GraphSAGELayer: W_self, W_neigh, bias
            p = {
                "w_self": jax.random.uniform(k1, (f_in, f_out), jnp.float32, -scale, scale),
                "w_neigh": jax.random.uniform(k2, (f_in, f_out), jnp.float32, -scale, scale),
                "b": jax.random.uniform(k3, (1, f_out), jnp.float32, -scale, scale),
                "kind": "sage",
            }
        else:                          # nn.Linear
            p = {
                "w": jax.random.uniform(k1, (f_in, f_out), jnp.float32, -scale, scale),
                "b": jax.random.uniform(k3, (1, f_out), jnp.float32, -scale, scale),
                "kind": "linear",
            }
        if i < n_layers - 1:           # nn.LayerNorm(layer_size[i+1], affine=True)
            p["gamma"] = jnp.ones((1, f_out), jnp.float32)
            p["beta"] = jnp.zeros((1, f_out), jnp.float32)
        params.append(p)
    return params


# ------------------------------ reference --------------------------------------


def graphsage_reference(params, a_hat, feat):
    """Strict f32, PyTorch-ordered reference: h = h Wself + (A_hat h) Wneigh + b."""
    hi = jax.lax.Precision.HIGHEST
    h = feat
    n_layers = len(params)
    for i, p in enumerate(params):
        if p["kind"] == "sage":
            agg = jnp.dot(a_hat, h, precision=hi)
            h = (jnp.dot(h, p["w_self"], precision=hi)
                 + jnp.dot(agg, p["w_neigh"], precision=hi) + p["b"])
        else:
            h = jnp.dot(h, p["w"], precision=hi) + p["b"]
        if i < n_layers - 1:
            mean = jnp.mean(h, axis=-1, keepdims=True)
            var = jnp.mean((h - mean) ** 2, axis=-1, keepdims=True)
            h = (h - mean) * jax.lax.rsqrt(var + 1e-5)
            h = h * p["gamma"] + p["beta"]
            h = jnp.maximum(h, 0.0)
    return h


# -------------------------------- main ------------------------------------------


if __name__ == "__main__":
    key = jax.random.PRNGKey(0)

    # Small GraphSAGE: layer_size=[32, 64, 32, 16], n_linear=1 -> 2 SAGE layers + 1 Linear.
    layer_size = [32, 64, 32, 16]
    n_linear = 1
    N = 128  # number of graph nodes

    key, k_feat, k_adj, k_par = jax.random.split(key, 4)

    # node features [N, F0]
    feat = jax.random.normal(k_feat, (N, layer_size[0]), jnp.float32)

    # deterministic random graph -> dense BINARY adjacency; mean aggregation is
    # A_hat = D_in^{-1} A, represented as (A01, inv_deg) for the kernel.
    adj = (jax.random.uniform(k_adj, (N, N)) < 0.05).astype(jnp.float32)
    adj = adj * (1.0 - jnp.eye(N, dtype=jnp.float32))          # no self loops in aggregation
    in_deg = jnp.maximum(adj.sum(axis=1, keepdims=True), 1.0)  # clamp like in_degrees().clamp(min=1)
    inv_deg = (1.0 / in_deg).astype(jnp.float32)               # [N, 1] f32
    a_hat = adj * inv_deg                                      # reference-only dense A_hat

    params = init_graphsage_params(k_par, layer_size, n_linear)
    ref = graphsage_reference(params, a_hat, feat)

    # 1) f32 compute path: tight check against the strict-f32 reference.
    a32, flat32, meta = prepare_graphsage_operands(params, adj, compute_dtype=jnp.float32)
    out_f32 = jax.block_until_ready(graphsage_forward(a32, inv_deg, feat, flat32, meta))
    assert out_f32.shape == (N, layer_size[-1]), out_f32.shape
    assert jnp.allclose(out_f32, ref, atol=1e-3, rtol=1e-3), "f32 path mismatch vs reference"

    # 2) bf16 compute path (recommended fast path): the 0/1 adjacency is exact in
    #    bf16 and inv_deg stays f32, so only activation/weight rounding (bounded
    #    by the LayerNorms) contributes error.
    a16, flat16, _ = prepare_graphsage_operands(params, adj, compute_dtype=jnp.bfloat16)
    out_bf16 = jax.block_until_ready(graphsage_forward(a16, inv_deg, feat, flat16, meta))
    assert out_bf16.shape == (N, layer_size[-1]), out_bf16.shape
    assert jnp.allclose(out_bf16, ref, atol=3e-2, rtol=3e-2), "bf16 path mismatch vs reference"

    print("KERNEL_OK")
</pallas_src>

<mosaic_0001>
module attributes {stable_mosaic.version = 11 : i64} {
  func.func @_fused_graphsage_kernel(%arg0: memref<128x128xf32, #tpu.memory_space<vmem>>, %arg1: memref<128x1xf32, #tpu.memory_space<vmem>>, %arg2: memref<128x32xf32, #tpu.memory_space<vmem>>, %arg3: memref<32x64xf32, #tpu.memory_space<vmem>>, %arg4: memref<32x64xf32, #tpu.memory_space<vmem>>, %arg5: memref<1x64xf32, #tpu.memory_space<vmem>>, %arg6: memref<1x64xf32, #tpu.memory_space<vmem>>, %arg7: memref<1x64xf32, #tpu.memory_space<vmem>>, %arg8: memref<64x32xf32, #tpu.memory_space<vmem>>, %arg9: memref<64x32xf32, #tpu.memory_space<vmem>>, %arg10: memref<1x32xf32, #tpu.memory_space<vmem>>, %arg11: memref<1x32xf32, #tpu.memory_space<vmem>>, %arg12: memref<1x32xf32, #tpu.memory_space<vmem>>, %arg13: memref<32x16xf32, #tpu.memory_space<vmem>>, %arg14: memref<1x16xf32, #tpu.memory_space<vmem>>, %arg15: memref<128x128xf32, #tpu.memory_space<vmem>>) attributes {dimension_semantics = [], scalar_prefetch = 0 : i64, scratch_operands = 0 : i64, tpu.core_type = #tpu.core_type<tc>} {
    %c0 = arith.constant 0 : index
    %c0_0 = arith.constant 0 : index
    %0 = vector.load %arg0[%c0, %c0_0] : memref<128x128xf32, #tpu.memory_space<vmem>>, vector<128x128xf32>
    %c0_1 = arith.constant 0 : index
    %c0_2 = arith.constant 0 : index
    %1 = vector.load %arg1[%c0_1, %c0_2] : memref<128x1xf32, #tpu.memory_space<vmem>>, vector<128x1xf32>
    %c0_3 = arith.constant 0 : index
    %c0_4 = arith.constant 0 : index
    %2 = vector.load %arg2[%c0_3, %c0_4] : memref<128x32xf32, #tpu.memory_space<vmem>>, vector<128x32xf32>
    %c0_5 = arith.constant 0 : index
    %c0_6 = arith.constant 0 : index
    %3 = vector.load %arg3[%c0_5, %c0_6] : memref<32x64xf32, #tpu.memory_space<vmem>>, vector<32x64xf32>
    %cst = arith.constant dense<0.000000e+00> : vector<128x64xf32>
    %4 = tpu.matmul %2, %3, %cst {dimension_numbers = #tpu.dot_dimension_numbers<[1], [0], [0], [1], [0, 0, 1, 1], [], []>} : vector<128x32xf32>, vector<32x64xf32>, vector<128x64xf32> -> vector<128x64xf32>
    %cst_7 = arith.constant dense<0.000000e+00> : vector<128x32xf32>
    %5 = tpu.matmul %0, %2, %cst_7 {dimension_numbers = #tpu.dot_dimension_numbers<[1], [0], [0], [1], [0, 0, 1, 1], [], []>} : vector<128x128xf32>, vector<128x32xf32>, vector<128x32xf32> -> vector<128x32xf32>
    %6 = vector.broadcast %1 : vector<128x1xf32> to vector<128x32xf32>
    %7 = arith.mulf %5, %6 : vector<128x32xf32>
    %c0_8 = arith.constant 0 : index
    %c0_9 = arith.constant 0 : index
    %8 = vector.load %arg4[%c0_8, %c0_9] : memref<32x64xf32, #tpu.memory_space<vmem>>, vector<32x64xf32>
    %cst_10 = arith.constant dense<0.000000e+00> : vector<128x64xf32>
    %9 = tpu.matmul %7, %8, %cst_10 {dimension_numbers = #tpu.dot_dimension_numbers<[1], [0], [0], [1], [0, 0, 1, 1], [], []>} : vector<128x32xf32>, vector<32x64xf32>, vector<128x64xf32> -> vector<128x64xf32>
    %10 = arith.addf %4, %9 : vector<128x64xf32>
    %c0_11 = arith.constant 0 : index
    %c0_12 = arith.constant 0 : index
    %11 = vector.load %arg5[%c0_11, %c0_12] : memref<1x64xf32, #tpu.memory_space<vmem>>, vector<1x64xf32>
    %12 = vector.broadcast %11 : vector<1x64xf32> to vector<128x64xf32>
    %13 = arith.addf %10, %12 : vector<128x64xf32>
    %cst_13 = arith.constant dense<0.000000e+00> : vector<128xf32>
    %14 = vector.multi_reduction <add>, %13, %cst_13 [1] : vector<128x64xf32> to vector<128xf32>
    %15 = vector.shape_cast %14 : vector<128xf32> to vector<128x1xf32>
    %cst_14 = arith.constant 6.400000e+01 : f32
    %16 = vector.broadcast %cst_14 : f32 to vector<128x1xf32>
    %17 = arith.divf %15, %16 : vector<128x1xf32>
    %18 = vector.broadcast %17 : vector<128x1xf32> to vector<128x64xf32>
    %19 = arith.subf %13, %18 : vector<128x64xf32>
    %20 = arith.mulf %19, %19 : vector<128x64xf32>
    %cst_15 = arith.constant dense<0.000000e+00> : vector<128xf32>
    %21 = vector.multi_reduction <add>, %20, %cst_15 [1] : vector<128x64xf32> to vector<128xf32>
    %22 = vector.shape_cast %21 : vector<128xf32> to vector<128x1xf32>
    %cst_16 = arith.constant 6.400000e+01 : f32
    %23 = vector.broadcast %cst_16 : f32 to vector<128x1xf32>
    %24 = arith.divf %22, %23 : vector<128x1xf32>
    %25 = vector.broadcast %17 : vector<128x1xf32> to vector<128x64xf32>
    %26 = arith.subf %13, %25 : vector<128x64xf32>
    %cst_17 = arith.constant 9.99999974E-6 : f32
    %27 = vector.broadcast %cst_17 : f32 to vector<128x1xf32>
    %28 = arith.addf %24, %27 : vector<128x1xf32>
    %29 = math.rsqrt %28 : vector<128x1xf32>
    %30 = vector.broadcast %29 : vector<128x1xf32> to vector<128x64xf32>
    %31 = arith.mulf %26, %30 : vector<128x64xf32>
    %c0_18 = arith.constant 0 : index
    %c0_19 = arith.constant 0 : index
    %32 = vector.load %arg6[%c0_18, %c0_19] : memref<1x64xf32, #tpu.memory_space<vmem>>, vector<1x64xf32>
    %33 = vector.broadcast %32 : vector<1x64xf32> to vector<128x64xf32>
    %34 = arith.mulf %31, %33 : vector<128x64xf32>
    %c0_20 = arith.constant 0 : index
    %c0_21 = arith.constant 0 : index
    %35 = vector.load %arg7[%c0_20, %c0_21] : memref<1x64xf32, #tpu.memory_space<vmem>>, vector<1x64xf32>
    %36 = vector.broadcast %35 : vector<1x64xf32> to vector<128x64xf32>
    %37 = arith.addf %34, %36 : vector<128x64xf32>
    %cst_22 = arith.constant 0.000000e+00 : f32
    %38 = vector.broadcast %cst_22 : f32 to vector<128x64xf32>
    %39 = arith.maximumf %37, %38 : vector<128x64xf32>
    %c0_23 = arith.constant 0 : index
    %c0_24 = arith.constant 0 : index
    %40 = vector.load %arg8[%c0_23, %c0_24] : memref<64x32xf32, #tpu.memory_space<vmem>>, vector<64x32xf32>
    %cst_25 = arith.constant dense<0.000000e+00> : vector<128x32xf32>
    %41 = tpu.matmul %39, %40, %cst_25 {dimension_numbers = #tpu.dot_dimension_numbers<[1], [0], [0], [1], [0, 0, 1, 1], [], []>} : vector<128x64xf32>, vector<64x32xf32>, vector<128x32xf32> -> vector<128x32xf32>
    %c0_26 = arith.constant 0 : index
    %c0_27 = arith.constant 0 : index
    %42 = vector.load %arg9[%c0_26, %c0_27] : memref<64x32xf32, #tpu.memory_space<vmem>>, vector<64x32xf32>
    %cst_28 = arith.constant dense<0.000000e+00> : vector<128x32xf32>
    %43 = tpu.matmul %39, %42, %cst_28 {dimension_numbers = #tpu.dot_dimension_numbers<[1], [0], [0], [1], [0, 0, 1, 1], [], []>} : vector<128x64xf32>, vector<64x32xf32>, vector<128x32xf32> -> vector<128x32xf32>
    %cst_29 = arith.constant dense<0.000000e+00> : vector<128x32xf32>
    %44 = tpu.matmul %0, %43, %cst_29 {dimension_numbers = #tpu.dot_dimension_numbers<[1], [0], [0], [1], [0, 0, 1, 1], [], []>} : vector<128x128xf32>, vector<128x32xf32>, vector<128x32xf32> -> vector<128x32xf32>
    %45 = vector.broadcast %1 : vector<128x1xf32> to vector<128x32xf32>
    %46 = arith.mulf %44, %45 : vector<128x32xf32>
    %47 = arith.addf %41, %46 : vector<128x32xf32>
    %c0_30 = arith.constant 0 : index
    %c0_31 = arith.constant 0 : index
    %48 = vector.load %arg10[%c0_30, %c0_31] : memref<1x32xf32, #tpu.memory_space<vmem>>, vector<1x32xf32>
    %49 = vector.broadcast %48 : vector<1x32xf32> to vector<128x32xf32>
    %50 = arith.addf %47, %49 : vector<128x32xf32>
    %cst_32 = arith.constant dense<0.000000e+00> : vector<128xf32>
    %51 = vector.multi_reduction <add>, %50, %cst_32 [1] : vector<128x32xf32> to vector<128xf32>
    %52 = vector.shape_cast %51 : vector<128xf32> to vector<128x1xf32>
    %cst_33 = arith.constant 3.200000e+01 : f32
    %53 = vector.broadcast %cst_33 : f32 to vector<128x1xf32>
    %54 = arith.divf %52, %53 : vector<128x1xf32>
    %55 = vector.broadcast %54 : vector<128x1xf32> to vector<128x32xf32>
    %56 = arith.subf %50, %55 : vector<128x32xf32>
    %57 = arith.mulf %56, %56 : vector<128x32xf32>
    %cst_34 = arith.constant dense<0.000000e+00> : vector<128xf32>
    %58 = vector.multi_reduction <add>, %57, %cst_34 [1] : vector<128x32xf32> to vector<128xf32>
    %59 = vector.shape_cast %58 : vector<128xf32> to vector<128x1xf32>
    %cst_35 = arith.constant 3.200000e+01 : f32
    %60 = vector.broadcast %cst_35 : f32 to vector<128x1xf32>
    %61 = arith.divf %59, %60 : vector<128x1xf32>
    %62 = vector.broadcast %54 : vector<128x1xf32> to vector<128x32xf32>
    %63 = arith.subf %50, %62 : vector<128x32xf32>
    %cst_36 = arith.constant 9.99999974E-6 : f32
    %64 = vector.broadcast %cst_36 : f32 to vector<128x1xf32>
    %65 = arith.addf %61, %64 : vector<128x1xf32>
    %66 = math.rsqrt %65 : vector<128x1xf32>
    %67 = vector.broadcast %66 : vector<128x1xf32> to vector<128x32xf32>
    %68 = arith.mulf %63, %67 : vector<128x32xf32>
    %c0_37 = arith.constant 0 : index
    %c0_38 = arith.constant 0 : index
    %69 = vector.load %arg11[%c0_37, %c0_38] : memref<1x32xf32, #tpu.memory_space<vmem>>, vector<1x32xf32>
    %70 = vector.broadcast %69 : vector<1x32xf32> to vector<128x32xf32>
    %71 = arith.mulf %68, %70 : vector<128x32xf32>
    %c0_39 = arith.constant 0 : index
    %c0_40 = arith.constant 0 : index
    %72 = vector.load %arg12[%c0_39, %c0_40] : memref<1x32xf32, #tpu.memory_space<vmem>>, vector<1x32xf32>
    %73 = vector.broadcast %72 : vector<1x32xf32> to vector<128x32xf32>
    %74 = arith.addf %71, %73 : vector<128x32xf32>
    %cst_41 = arith.constant 0.000000e+00 : f32
    %75 = vector.broadcast %cst_41 : f32 to vector<128x32xf32>
    %76 = arith.maximumf %74, %75 : vector<128x32xf32>
    %c0_42 = arith.constant 0 : index
    %c0_43 = arith.constant 0 : index
    %77 = vector.load %arg13[%c0_42, %c0_43] : memref<32x16xf32, #tpu.memory_space<vmem>>, vector<32x16xf32>
    %cst_44 = arith.constant dense<0.000000e+00> : vector<128x16xf32>
    %78 = tpu.matmul %76, %77, %cst_44 {dimension_numbers = #tpu.dot_dimension_numbers<[1], [0], [0], [1], [0, 0, 1, 1], [], []>} : vector<128x32xf32>, vector<32x16xf32>, vector<128x16xf32> -> vector<128x16xf32>
    %c0_45 = arith.constant 0 : index
    %c0_46 = arith.constant 0 : index
    %79 = vector.load %arg14[%c0_45, %c0_46] : memref<1x16xf32, #tpu.memory_space<vmem>>, vector<1x16xf32>
    %80 = vector.broadcast %79 : vector<1x16xf32> to vector<128x16xf32>
    %81 = arith.addf %78, %80 : vector<128x16xf32>
    %cst_47 = arith.constant 0.000000e+00 : f32
    %82 = vector.broadcast %cst_47 : f32 to vector<128x112xf32>
    %83 = tpu.concatenate %81, %82 in 1 : vector<128x16xf32>, vector<128x112xf32> -> vector<128x128xf32>
    %c0_48 = arith.constant 0 : index
    %c0_49 = arith.constant 0 : index
    %84 = vector.load %arg15[%c0_48, %c0_49] : memref<128x128xf32, #tpu.memory_space<vmem>>, vector<128x128xf32>
    tpu.vector_store %arg15[%c0_48, %c0_49], %83 {strides = array<i32>} : memref<128x128xf32, #tpu.memory_space<vmem>>, vector<128x128xf32>,
    return
  }
}

</mosaic_0001>

<bundles_post_ra>
// kernel: tpu_custom_call.1
= control target key start
LH: loop header
LB: loop body
LE: loop exit
PB: predicated region body
PF: predicated region fallthrough
CT: control target
= control target key end

     0   :  { %v2888_v5 = vmov 0   ;;  %s4027_s0 = inlined_call_operand.vmem [shape: f32[128,128], index: 0, kind: input, shape index: {}]   ;;  %s4028_s1 = inlined_call_operand.vmem [shape: f32[128,1], index: 1, kind: input, shape index: {}]   ;;  %s4029_s2 = inlined_call_operand.vmem [shape: f32[128,32], index: 2, kind: input, shape index: {}]   ;;  %s4030_s3 = inlined_call_operand.vmem [shape: f32[32,64], index: 3, kind: input, shape index: {}]   ;;  %s4031_s4 = inlined_call_operand.vmem [shape: f32[32,64], index: 4, kind: input, shape index: {}]   ;;  %s4032_s5 = inlined_call_operand.vmem [shape: f32[1,64], index: 5, kind: input, shape index: {}]   ;;  %s4033_s6 = inlined_call_operand.vmem [shape: f32[1,64], index: 6, kind: input, shape index: {}]   ;;  %s4034_s7 = inlined_call_operand.vmem [shape: f32[1,64], index: 7, kind: input, shape index: {}]   ;;  %s4035_s8 = inlined_call_operand.vmem [shape: f32[64,32], index: 8, kind: input, shape index: {}]   ;;  %s4036_s9 = inlined_call_operand.vmem [shape: f32[64,32], index: 9, kind: input, shape index: {}]   ;;  %s4037_s10 = inlined_call_operand.vmem [shape: f32[1,32], index: 10, kind: input, shape index: {}]   ;;  %s4038_s11 = inlined_call_operand.vmem [shape: f32[1,32], index: 11, kind: input, shape index: {}]   ;;  %s4039_s12 = inlined_call_operand.vmem [shape: f32[1,32], index: 12, kind: input, shape index: {}]   ;;  %s4040_s13 = inlined_call_operand.vmem [shape: f32[32,16], index: 13, kind: input, shape index: {}]   ;;  %s4041_s14 = inlined_call_operand.vmem [shape: f32[1,16], index: 14, kind: input, shape index: {}]   ;;  %s4042_s15 = inlined_call_operand.hbm [shape: f32[128,128], index: 15, kind: output, shape index: {}]  }
   0x1   :  { %v2975_v0 = vld [vmem:[%s4029_s2] sm:$0xff]  ;;  %v2980_v1 = vld [vmem:[%s4029_s2 + $0x8] sm:$0xff]  ;;  %v2985_v2 = vld [vmem:[%s4029_s2 + $0x10] sm:$0xff]  ;;  %2783 = vset.pattern.permute.xlu0 %v2888_v5  ;;  %2784 = vset.pattern.permute.xlu1 %v2888_v5 }
   0x2   :  { %v2639_v3 = vpack.c.bf16 %v2980_v1, %v2975_v0  ;;  %v2992_v4 = vld [vmem:[%s4029_s2 + $0x18] sm:$0xff]  ;;  %v2999_v7 = vld [vmem:[%s4029_s2 + $0x20] sm:$0xff]  ;;  %v3004_v8 = vld [vmem:[%s4029_s2 + $0x28] sm:$0xff] }
   0x3   :  { %v2643_v6 = vpack.c.bf16 %v2992_v4, %v2985_v2  ;;  %v2647_v9 = vpack.c.bf16 %v3004_v8, %v2999_v7  ;;  %v3011_v10 = vld [vmem:[%s4027_s0] sm:$0xff]  ;;  %v3016_v11 = vld [vmem:[%s4029_s2 + $0x30] sm:$0xff]  ;;  %v3021_v12 = vld [vmem:[%s4029_s2 + $0x38] sm:$0xff] }
   0x4   :  { %2640 = vmatprep.subr.bf16.mxu0 %v2639_v3  ;;  %2383 = vmatprep.mubr.f32.mxu0 %v3011_v10  ;;  %v2651_v13 = vpack.c.bf16 %v3021_v12, %v3016_v11  ;;  %v3029_v14 = vld [vmem:[%s4029_s2 + $0x40] sm:$0xff]  ;;  %v3034_v15 = vld [vmem:[%s4029_s2 + $0x48] sm:$0xff]  ;;  %v69_v17 = vld [vmem:[%s4028_s1 + $0x10] sm:$0xff] }
   0x5   :  { %2642 = vmatpush3.bf16.msra.mxu0 %v2639_v3  ;;  %v67_v16 = vld [vmem:[%s4028_s1] sm:$0xff]  ;;  %260 = vperm.xlu1 %2784, %v69_v17   ;;  %v68_v18 = vld [vmem:[%s4028_s1 + $0x8] sm:$0xff]  ;;  %v2655_v19 = vpack.c.bf16 %v3034_v15, %v3029_v14  ;;  %v70_v20 = vld [vmem:[%s4028_s1 + $0x18] sm:$0xff] }
   0x6   :  { %2644 = vmatprep.subr.bf16.mxu0 %v2643_v6  ;;  %250 = vperm.xlu0 %2783, %v67_v16   ;;  %v3053_v21 = vld [vmem:[%s4029_s2 + $0x50] sm:$0xff]  ;;  %v3058_v22 = vld [vmem:[%s4029_s2 + $0x58] sm:$0xff]  ;;  %v71_v23 = vld [vmem:[%s4028_s1 + $0x20] sm:$0xff] }
   0x9   :  { %2646 = vmatpush3.bf16.msra.mxu0 %v2643_v6  ;;  %265 = vperm.xlu1 %2784, %v70_v20  }
   0xa   :  { %2648 = vmatprep.subr.bf16.mxu0 %v2647_v9  ;;  %255 = vperm.xlu0 %2783, %v68_v18  }
   0xd   :  { %2650 = vmatpush3.bf16.msra.mxu0 %v2647_v9 }
   0xe   :  { %2652 = vmatprep.subr.bf16.mxu0 %v2651_v13 }
  0x11   :  { %2654 = vmatpush3.bf16.msra.mxu0 %v2651_v13 }
  0x12   :  { %20 = vsyncpa [#allocation3], 0  ;;  %2656 = vmatprep.subr.bf16.mxu0 %v2655_v19  ;;  %v2659_v24 = vpack.c.bf16 %v3058_v22, %v3053_v21  ;;  %v72_v25 = vld [vmem:[%s4028_s1 + $0x28] sm:$0xff]  ;;  %v3071_v26 = vld [vmem:[%s4029_s2 + $0x60] sm:$0xff]  ;;  %270 = vperm.xlu0 %2783, %v71_v23   ;;  %vm348_vm0 = vcmask 261120   ;;  %vm758_vm1 = vcmask 523264  }
  0x13   :  { %v3076_v27 = vld [vmem:[%s4029_s2 + $0x68] sm:$0xff]  ;;  %275 = vperm.xlu1 %2784, %v72_v25   ;;  %v73_v28 = vld [vmem:[%s4028_s1 + $0x30] sm:$0xff]  ;;  %v74_v30 = vld [vmem:[%s4028_s1 + $0x38] sm:$0xff]  ;;  %vm2043_vm2 = vcmask 130048  }
  0x14   :  { %v2663_v29 = vpack.c.bf16 %v3076_v27, %v3071_v26  ;;  %v3089_v31 = vld [vmem:[%s4029_s2 + $0x70] sm:$0xff]  ;;  %v3094_v32 = vld [vmem:[%s4029_s2 + $0x78] sm:$0xff]  ;;  %v75_v33 = vld [vmem:[%s4028_s1 + $0x40] sm:$0xff] }
  0x15   :  { %2658 = vmatpush3.bf16.msra.mxu0 %v2655_v19  ;;  %v2667_v34 = vpack.c.bf16 %v3094_v32, %v3089_v31  ;;  %v76_v35 = vld [vmem:[%s4028_s1 + $0x48] sm:$0xff]  ;;  %v77_v36 = vld [vmem:[%s4028_s1 + $0x50] sm:$0xff]  ;;  %v78_v37 = vld [vmem:[%s4028_s1 + $0x58] sm:$0xff] }
  0x16   :  { %2660 = vmatprep.subr.bf16.mxu0 %v2659_v24  ;;  %280 = vperm.xlu0 %2783, %v73_v28   ;;  %v52_v38 = vld [vmem:[%s4027_s0 + $0x8] sm:$0xff]  ;;  %v79_v39 = vld [vmem:[%s4028_s1 + $0x60] sm:$0xff]  ;;  %v53_v40 = vld [vmem:[%s4027_s0 + $0x10] sm:$0xff] }
  0x17   :  { %285 = vperm.xlu1 %2784, %v74_v30   ;;  %v80_v41 = vld [vmem:[%s4028_s1 + $0x68] sm:$0xff]  ;;  %v344_v42 = vld [vmem:[%s4031_s4] sm:$0xff]  ;;  %v54_v45 = vld [vmem:[%s4027_s0 + $0x18] sm:$0xff] }
  0x18   :  { %v345_v43 = vld [vmem:[%s4031_s4 + $0x8] sm:$0xff]  ;;  %v81_v46 = vld [vmem:[%s4028_s1 + $0x70] sm:$0xff]  ;;  %v55_v47 = vld [vmem:[%s4027_s0 + $0x20] sm:$0xff] }
  0x19   :  { %2662 = vmatpush3.bf16.msra.mxu0 %v2659_v24  ;;  %v2671_v44 = vpack.c.bf16 %v345_v43, %v344_v42  ;;  %v82_v48 = vld [vmem:[%s4028_s1 + $0x78] sm:$0xff]  ;;  %v56_v49 = vld [vmem:[%s4027_s0 + $0x28] sm:$0xff]  ;;  %v57_v50 = vld [vmem:[%s4027_s0 + $0x30] sm:$0xff] }
  0x1a   :  { %2664 = vmatprep.subr.bf16.mxu0 %v2663_v29  ;;  %290 = vperm.xlu0 %2783, %v75_v33   ;;  %v58_v51 = vld [vmem:[%s4027_s0 + $0x38] sm:$0xff]  ;;  %v59_v52 = vld [vmem:[%s4027_s0 + $0x40] sm:$0xff]  ;;  %v60_v53 = vld [vmem:[%s4027_s0 + $0x48] sm:$0xff] }
  0x1b   :  { %295 = vperm.xlu1 %2784, %v76_v35   ;;  %2672 = vmatprep.subr.bf16.mxu1 %v2671_v44  ;;  %v61_v54 = vld [vmem:[%s4027_s0 + $0x50] sm:$0xff]  ;;  %v62_v55 = vld [vmem:[%s4027_s0 + $0x58] sm:$0xff]  ;;  %v63_v56 = vld [vmem:[%s4027_s0 + $0x60] sm:$0xff] }
  0x1c   :  { %2674 = vmatpush3.bf16.msra.mxu1 %v2671_v44  ;;  %v64_v57 = vld [vmem:[%s4027_s0 + $0x68] sm:$0xff]  ;;  %v65_v58 = vld [vmem:[%s4027_s0 + $0x70] sm:$0xff]  ;;  %v66_v59 = vld [vmem:[%s4027_s0 + $0x78] sm:$0xff] }
  0x1d   :  { %2666 = vmatpush3.bf16.msra.mxu0 %v2663_v29  ;;  %v346_v60 = vld [vmem:[%s4031_s4 + $0x10] sm:$0xff]  ;;  %v347_v61 = vld [vmem:[%s4031_s4 + $0x18] sm:$0xff]  ;;  %v99_v63 = vld [vmem:[%s4030_s3] sm:$0xff] }
  0x1e   :  { %2668 = vmatprep.subr.bf16.mxu0 %v2667_v34  ;;  %300 = vperm.xlu0 %2783, %v77_v36   ;;  %v2675_v62 = vpack.c.bf16 %v347_v61, %v346_v60  ;;  %v100_v3 = vld [vmem:[%s4030_s3 + $0x8] sm:$0xff]  ;;  %v101_v20 = vld [vmem:[%s4030_s3 + $0x10] sm:$0xff]  ;;  %v102_v23 = vld [vmem:[%s4030_s3 + $0x18] sm:$0xff] }
  0x1f   :  { %305 = vperm.xlu1 %2784, %v78_v37   ;;  %v2679_v5 = vpack.c.bf16 %v100_v3, %v99_v63  ;;  %v2683_v29 = vpack.c.bf16 %v102_v23, %v101_v20 }
  0x20   :  { %2676 = vmatprep.subr.bf16.mxu1 %v2675_v62 }
  0x21   :  { %2670 = vmatpush3.bf16.msra.mxu0 %v2667_v34  ;;  %2678 = vmatpush3.bf16.msra.mxu1 %v2675_v62 }
  0x22   :  { %310 = vperm.xlu0 %2783, %v79_v39   ;;  %2680 = vmatprep.subr.bf16.mxu1 %v2679_v5 }
  0x23   :  { %315 = vperm.xlu1 %2784, %v80_v41  }
  0x24   :  { %2384 = vmatmul.mubr.f32.vlgmr.msra.gmra.mrb[0].mxu0 %v52_v38 }
  0x25   :  { %2386 = vmatprep.mubr.f32.mxu0 %v53_v40 }
  0x26   :  { %320 = vperm.xlu0 %2783, %v81_v46  }
  0x27   :  { %325 = vperm.xlu1 %2784, %v82_v48  }
  0x28   :  { %2387 = vmatmul.mubr.f32.gmra.mrb[2].mxu0 %v54_v45 }
  0x29   :  { %2389 = vmatprep.mubr.f32.mxu0 %v55_v47 }
  0x2c   :  { %2390 = vmatmul.mubr.f32.gmra.mrb[4].mxu0 %v56_v49 }
  0x2d   :  { %2392 = vmatprep.mubr.f32.mxu0 %v57_v50 }
  0x30   :  { %2393 = vmatmul.mubr.f32.gmra.mrb[6].mxu0 %v58_v51 }
  0x31   :  { %2395 = vmatprep.mubr.f32.mxu0 %v59_v52 }
  0x34   :  { %2396 = vmatmul.mubr.f32.gmra.mrb[8].mxu0 %v60_v53 }
  0x35   :  { %2398 = vmatprep.mubr.f32.mxu0 %v61_v54 }
  0x38   :  { %2399 = vmatmul.mubr.f32.gmra.mrb[10].mxu0 %v62_v55 }
  0x39   :  { %2401 = vmatprep.mubr.f32.mxu0 %v63_v56 }
  0x3c   :  { %2402 = vmatmul.mubr.f32.gmra.mrb[12].mxu0 %v64_v57 }
  0x3d   :  { %2404 = vmatprep.mubr.f32.mxu0 %v65_v58 }
  0x40   :  { %2405 = vmatmul.mubr.f32.gmra.mrb[14].mxu0 %v66_v59 }
  0x84   :  { %v3187_v9 = vpop.permute.xlu1 %260 }
  0x85   :  { %v3185_v6 = vpop.permute.xlu0 %250 }
  0x88   :  { %v3191_v16 = vpop.permute.xlu1 %265 }
  0x89   :  { %v3189_v13 = vpop.permute.xlu0 %255 }
  0x91   :  { %v3193_v17 = vpop.permute.xlu0 %270 }
  0x92   :  { %v3195_v18 = vpop.permute.xlu1 %275 }
  0x95   :  { %v3206_v33 = vpop.permute.xlu0 %280 }
  0x96   :  { %v3209_v35 = vpop.permute.xlu1 %285 }
  0x99   :  { %v3216_v41 = vpop.permute.xlu0 %290 }
  0x9a   :  { %v3219_v43 = vpop.permute.xlu1 %295 }
  0x9d   :  { %v3226_v49 = vpop.permute.xlu0 %300 }
  0x9e   :  { %v3229_v51 = vpop.permute.xlu1 %305 }
  0xa1   :  { %v3236_v57 = vpop.permute.xlu0 %310 }
  0xa2   :  { %v3239_v59 = vpop.permute.xlu1 %315 }
  0xa6   :  { %v3249_v20 = vpop.permute.xlu1 %325 }
  0xf7   :  { %v2385_v19 = vpop.f32.mrb[0].mxu0 }
  0xf8   :  { %v169_v24 = vpop.f32.mrb[1].mxu0  ;;  %v329_v28 = vmul.f32 %v2385_v19, %v3189_v13 }
  0xf9   :  { %v328_v25 = vmul.f32 %v3185_v6, %v169_v24 }
  0xfb   :  { %v2388_v30 = vpop.f32.mrb[2].mxu0  ;;  %2415 = vmatprep.mubr.msk.f32.mxu1 %vm348_vm0, %v328_v25 }
  0xfc   :  { %v179_v34 = vpop.f32.mrb[3].mxu0  ;;  %2416 = vmatmul.mubr.msk.f32.vlgmr.msra.gmra.mrb[0].mxu1 %vm348_vm0, %v329_v28  ;;  %v331_v37 = vmul.f32 %v2388_v30, %v3191_v16 }
  0xfd   :  { %v330_v36 = vmul.f32 %v3187_v9, %v179_v34  ;;  %2682 = vmatpush3.bf16.msra.mxu1 %v2679_v5  ;;  %v3246_v5 = vpop.permute.xlu0 %320 }
  0xfe   :  { %2684 = vmatprep.subr.bf16.mxu1 %v2683_v29 }
  0xff   :  { %v2391_v38 = vpop.f32.mrb[4].mxu0  ;;  %2418 = vmatprep.mubr.msk.f32.mxu1 %vm348_vm0, %v330_v36 }
 0x100   :  { %v189_v39 = vpop.f32.mrb[5].mxu0  ;;  %2419 = vmatmul.mubr.msk.f32.gmra.mrb[2].mxu1 %vm348_vm0, %v331_v37  ;;  %v333_v42 = vmul.f32 %v2391_v38, %v3195_v18 }
 0x101   :  { %v332_v40 = vmul.f32 %v3193_v17, %v189_v39  ;;  %2686 = vmatpush3.bf16.msra.mxu1 %v2683_v29 }
 0x103   :  { %v2394_v44 = vpop.f32.mrb[6].mxu0  ;;  %2421 = vmatprep.mubr.msk.f32.mxu1 %vm348_vm0, %v332_v40 }
 0x104   :  { %v199_v45 = vpop.f32.mrb[7].mxu0  ;;  %2422 = vmatmul.mubr.msk.f32.gmra.mrb[4].mxu1 %vm348_vm0, %v333_v42  ;;  %v335_v47 = vmul.f32 %v2394_v44, %v3209_v35 }
 0x105   :  { %v334_v46 = vmul.f32 %v3206_v33, %v199_v45 }
 0x107   :  { %v2397_v48 = vpop.f32.mrb[8].mxu0  ;;  %2424 = vmatprep.mubr.msk.f32.mxu1 %vm348_vm0, %v334_v46 }
 0x108   :  { %v209_v50 = vpop.f32.mrb[9].mxu0  ;;  %2425 = vmatmul.mubr.msk.f32.gmra.mrb[6].mxu1 %vm348_vm0, %v335_v47  ;;  %v337_v53 = vmul.f32 %v2397_v48, %v3219_v43 }
 0x109   :  { %v336_v52 = vmul.f32 %v3216_v41, %v209_v50 }
 0x10b   :  { %v2400_v54 = vpop.f32.mrb[10].mxu0  ;;  %2427 = vmatprep.mubr.msk.f32.mxu1 %vm348_vm0, %v336_v52 }
 0x10c   :  { %v219_v55 = vpop.f32.mrb[11].mxu0  ;;  %2428 = vmatmul.mubr.msk.f32.gmra.mrb[8].mxu1 %vm348_vm0, %v337_v53  ;;  %v339_v58 = vmul.f32 %v2400_v54, %v3229_v51 }
 0x10d   :  { %v338_v56 = vmul.f32 %v3226_v49, %v219_v55 }
 0x10f   :  { %v2403_v60 = vpop.f32.mrb[12].mxu0  ;;  %2430 = vmatprep.mubr.msk.f32.mxu1 %vm348_vm0, %v338_v56 }
 0x110   :  { %v229_v61 = vpop.f32.mrb[13].mxu0  ;;  %2431 = vmatmul.mubr.msk.f32.gmra.mrb[10].mxu1 %vm348_vm0, %v339_v58  ;;  %v341_v63 = vmul.f32 %v2403_v60, %v3239_v59 }
 0x111   :  { %v340_v62 = vmul.f32 %v3236_v57, %v229_v61 }
 0x113   :  { %v2406_v3 = vpop.f32.mrb[14].mxu0  ;;  %2433 = vmatprep.mubr.msk.f32.mxu1 %vm348_vm0, %v340_v62 }
 0x114   :  { %v239_v19 = vpop.f32.mrb[15].mxu0  ;;  %2434 = vmatmul.mubr.msk.f32.gmra.mrb[12].mxu1 %vm348_vm0, %v341_v63  ;;  %v343_v24 = vmul.f32 %v2406_v3, %v3249_v20 }
 0x115   :  { %v342_v23 = vmul.f32 %v3246_v5, %v239_v19 }
 0x117   :  { %2436 = vmatprep.mubr.msk.f32.mxu1 %vm348_vm0, %v342_v23 }
 0x118   :  { %2437 = vmatmul.mubr.msk.f32.gmra.mrb[14].mxu1 %vm348_vm0, %v343_v24 }
 0x119   :  { %2447 = vmatprep.mubr.msk.f32.mxu1 %vm348_vm0, %v2975_v0  ;;  %v2124_v0 = vld [vmem:[%s4032_s5] ss:$0 sm:$0xff] }
 0x11c   :  { %2448 = vmatmul.mubr.msk.f32.vlgmr.msra.gmra.mrb[0].mxu1 %vm348_vm0, %v2980_v1 }
 0x11d   :  { %2450 = vmatprep.mubr.msk.f32.mxu1 %vm348_vm0, %v2985_v2 }
 0x120   :  { %2451 = vmatmul.mubr.msk.f32.gmra.mrb[2].mxu1 %vm348_vm0, %v2992_v4 }
 0x121   :  { %2453 = vmatprep.mubr.msk.f32.mxu1 %vm348_vm0, %v2999_v7 }
 0x124   :  { %2454 = vmatmul.mubr.msk.f32.gmra.mrb[4].mxu1 %vm348_vm0, %v3004_v8 }
 0x125   :  { %2456 = vmatprep.mubr.msk.f32.mxu1 %vm348_vm0, %v3016_v11 }
 0x128   :  { %2457 = vmatmul.mubr.msk.f32.gmra.mrb[6].mxu1 %vm348_vm0, %v3021_v12 }
 0x129   :  { %2459 = vmatprep.mubr.msk.f32.mxu1 %vm348_vm0, %v3029_v14 }
 0x12c   :  { %2460 = vmatmul.mubr.msk.f32.gmra.mrb[8].mxu1 %vm348_vm0, %v3034_v15 }
 0x12d   :  { %2462 = vmatprep.mubr.msk.f32.mxu1 %vm348_vm0, %v3053_v21 }
 0x130   :  { %2463 = vmatmul.mubr.msk.f32.gmra.mrb[10].mxu1 %vm348_vm0, %v3058_v22 }
 0x131   :  { %2465 = vmatprep.mubr.msk.f32.mxu1 %vm348_vm0, %v3071_v26 }
 0x134   :  { %2466 = vmatmul.mubr.msk.f32.gmra.mrb[12].mxu1 %vm348_vm0, %v3076_v27 }
 0x135   :  { %2468 = vmatprep.mubr.msk.f32.mxu1 %vm348_vm0, %v3089_v31 }
 0x138   :  { %2469 = vmatmul.mubr.msk.f32.gmra.mrb[14].mxu1 %vm348_vm0, %v3094_v32 }
 0x139   :  { %2543 = vmatprep.mubr.f32.mxu1 %v3011_v10 }
 0x1ef   :  { %v2449_v1 = vpop.f32.mrb[0].mxu1 }
 0x1f0   :  { %v3291_v2 = vadd.f32 %v2449_v1, %v2124_v0  ;;  %v656_v4 = vpop.f32.mrb[1].mxu1 }
 0x1f1   :  { %v3293_v7 = vadd.f32 %v2124_v0, %v656_v4  ;;  %v1038_v4 = vld [vmem:[%s4036_s9] sm:$0xff] }
 0x1f2   :  { %v762_v8 = vsel %vm758_vm1, %v3291_v2, 0.0 }
 0x1f3   :  { %763 = vadd.xlane.f32.xlu1 %v762_v8  ;;  %v2452_v11 = vpop.f32.mrb[2].mxu1  ;;  %v759_v12 = vsel %vm758_vm1, %v3293_v7, 0.0 }
 0x1f4   :  { %760 = vadd.xlane.f32.xlu0 %v759_v12  ;;  %v666_v10 = vpop.f32.mrb[3].mxu1  ;;  %v3301_v15 = vadd.f32 %v2452_v11, %v2124_v0 }
 0x1f5   :  { %v3299_v14 = vadd.f32 %v2124_v0, %v666_v10 }
 0x1f6   :  { %v768_v25 = vsel %vm758_vm1, %v3301_v15, 0.0 }
 0x1f7   :  { %v2455_v21 = vpop.f32.mrb[4].mxu1  ;;  %v765_v22 = vsel %vm758_vm1, %v3299_v14, 0.0 }
 0x1f8   :  { %766 = vadd.xlane.f32.xlu0 %v765_v22  ;;  %v676_v26 = vpop.f32.mrb[5].mxu1  ;;  %v3307_v31 = vadd.f32 %v2455_v21, %v2124_v0 }
 0x1f9   :  { %v3305_v27 = vadd.f32 %v2124_v0, %v676_v26 }
 0x1fa   :  { %v774_v37 = vsel %vm758_vm1, %v3307_v31, 0.0 }
 0x1fb   :  { %v2458_v32 = vpop.f32.mrb[6].mxu1  ;;  %v771_v28 = vsel %vm758_vm1, %v3305_v27, 0.0 }
 0x1fc   :  { %769 = vadd.xlane.f32.xlu0 %v768_v25  ;;  %772 = vadd.xlane.f32.xlu1 %v771_v28  ;;  %v686_v29 = vpop.f32.mrb[7].mxu1  ;;  %v3315_v34 = vadd.f32 %v2458_v32, %v2124_v0 }
 0x1fd   :  { %v3313_v30 = vadd.f32 %v2124_v0, %v686_v29 }
 0x1fe   :  { %v780_v45 = vsel %vm758_vm1, %v3315_v34, 0.0 }
 0x1ff   :  { %v2461_v36 = vpop.f32.mrb[8].mxu1  ;;  %v777_v38 = vsel %vm758_vm1, %v3313_v30, 0.0 }
 0x200   :  { %775 = vadd.xlane.f32.xlu0 %v774_v37  ;;  %778 = vadd.xlane.f32.xlu1 %v777_v38  ;;  %v696_v39 = vpop.f32.mrb[9].mxu1  ;;  %v3323_v42 = vadd.f32 %v2461_v36, %v2124_v0 }
 0x201   :  { %v3321_v40 = vadd.f32 %v2124_v0, %v696_v39 }
 0x202   :  { %v786_v53 = vsel %vm758_vm1, %v3323_v42, 0.0 }
 0x203   :  { %v2464_v44 = vpop.f32.mrb[10].mxu1  ;;  %v783_v46 = vsel %vm758_vm1, %v3321_v40, 0.0 }
 0x204   :  { %781 = vadd.xlane.f32.xlu0 %v780_v45  ;;  %784 = vadd.xlane.f32.xlu1 %v783_v46  ;;  %v706_v47 = vpop.f32.mrb[11].mxu1  ;;  %v3331_v50 = vadd.f32 %v2464_v44, %v2124_v0 }
 0x205   :  { %v3329_v48 = vadd.f32 %v2124_v0, %v706_v47 }
 0x206   :  { %v792_v61 = vsel %vm758_vm1, %v3331_v50, 0.0 }
 0x207   :  { %v2467_v52 = vpop.f32.mrb[12].mxu1  ;;  %v789_v54 = vsel %vm758_vm1, %v3329_v48, 0.0 }
 0x208   :  { %787 = vadd.xlane.f32.xlu0 %v786_v53  ;;  %790 = vadd.xlane.f32.xlu1 %v789_v54  ;;  %v716_v55 = vpop.f32.mrb[13].mxu1  ;;  %v3339_v58 = vadd.f32 %v2467_v52, %v2124_v0 }
 0x209   :  { %v3337_v56 = vadd.f32 %v2124_v0, %v716_v55 }
 0x20a   :  { %v798_v23 = vsel %vm758_vm1, %v3339_v58, 0.0 }
 0x20b   :  { %v2470_v60 = vpop.f32.mrb[14].mxu1  ;;  %v795_v62 = vsel %vm758_vm1, %v3337_v56, 0.0 }
 0x20c   :  { %793 = vadd.xlane.f32.xlu0 %v792_v61  ;;  %796 = vadd.xlane.f32.xlu1 %v795_v62  ;;  %v726_v63 = vpop.f32.mrb[15].mxu1  ;;  %v3347_v19 = vadd.f32 %v2470_v60, %v2124_v0 }
 0x20d   :  { %v3345_v3 = vadd.f32 %v2124_v0, %v726_v63  ;;  %v1039_v0 = vld [vmem:[%s4036_s9 + $0x8] sm:$0xff] }
 0x20e   :  { %v804_v1 = vsel %vm758_vm1, %v3347_v19, 0.0  ;;  %v2687_v8 = vpack.c.bf16 %v1039_v0, %v1038_v4 }
 0x20f   :  { %v801_v24 = vsel %vm758_vm1, %v3345_v3, 0.0 }
 0x210   :  { %799 = vadd.xlane.f32.xlu0 %v798_v23  ;;  %802 = vadd.xlane.f32.xlu1 %v801_v24 }
 0x211   :  { %2688 = vmatprep.subr.bf16.mxu0 %v2687_v8 }
 0x212   :  { %2690 = vmatpush3.bf16.msra.mxu0 %v2687_v8 }
 0x214   :  { %805 = vadd.xlane.f32.xlu0 %v804_v1 }
 0x280   :  { %v764_v11 = vpop.xlane.xlu1 %763 }
 0x281   :  { %v809_v12 = vmul.f32 0.015625, %v764_v11  ;;  %v761_v10 = vpop.xlane.xlu0 %760 }
 0x282   :  { %v808_v21 = vmul.f32 0.015625, %v761_v10 }
 0x283   :  { %v3362_v22 = vsub.f32 %v3291_v2, %v809_v12 }
 0x284   :  { %v3365_v26 = vsub.f32 %v3293_v7, %v808_v21 }
 0x285   :  { %v767_v32 = vpop.xlane.xlu0 %766  ;;  %v841_v25 = vmul.f32 %v3362_v22, %v3362_v22 }
 0x286   :  { %v810_v28 = vmul.f32 0.015625, %v767_v32  ;;  %v840_v29 = vmul.f32 %v3365_v26, %v3365_v26 }
 0x287   :  { %v859_v36 = vsel %vm758_vm1, %v841_v25, 0.0 }
 0x288   :  { %v3373_v37 = vsub.f32 %v3299_v14, %v810_v28  ;;  %860 = vadd.xlane.f32.xlu0 %v859_v36  ;;  %v856_v2 = vsel %vm758_vm1, %v840_v29, 0.0 }
 0x289   :  { %v770_v38 = vpop.xlane.xlu0 %769  ;;  %v773_v39 = vpop.xlane.xlu1 %772  ;;  %857 = vadd.xlane.f32.xlu1 %v856_v2 }
 0x28a   :  { %v811_v7 = vmul.f32 0.015625, %v770_v38  ;;  %v812_v44 = vmul.f32 0.015625, %v773_v39  ;;  %v842_v45 = vmul.f32 %v3373_v37, %v3373_v37 }
 0x28c   :  { %v3379_v46 = vsub.f32 %v3301_v15, %v811_v7  ;;  %v3382_v47 = vsub.f32 %v3305_v27, %v812_v44  ;;  %v862_v14 = vsel %vm758_vm1, %v842_v45, 0.0 }
 0x28d   :  { %v776_v52 = vpop.xlane.xlu0 %775  ;;  %v779_v53 = vpop.xlane.xlu1 %778  ;;  %863 = vadd.xlane.f32.xlu1 %v862_v14 }
 0x28e   :  { %v813_v54 = vmul.f32 0.015625, %v776_v52  ;;  %v814_v55 = vmul.f32 0.015625, %v779_v53  ;;  %v843_v60 = vmul.f32 %v3379_v46, %v3379_v46  ;;  %v844_v61 = vmul.f32 %v3382_v47, %v3382_v47 }
 0x290   :  { %v3390_v62 = vsub.f32 %v3307_v31, %v813_v54  ;;  %v3393_v15 = vsub.f32 %v3313_v30, %v814_v55  ;;  %v865_v27 = vsel %vm758_vm1, %v843_v60, 0.0  ;;  %v868_v63 = vsel %vm758_vm1, %v844_v61, 0.0 }
 0x291   :  { %v782_v23 = vpop.xlane.xlu0 %781  ;;  %v785_v24 = vpop.xlane.xlu1 %784  ;;  %866 = vadd.xlane.f32.xlu0 %v865_v27  ;;  %869 = vadd.xlane.f32.xlu1 %v868_v63 }
 0x292   :  { %v815_v1 = vmul.f32 0.015625, %v782_v23  ;;  %v816_v4 = vmul.f32 0.015625, %v785_v24  ;;  %v845_v0 = vmul.f32 %v3390_v62, %v3390_v62  ;;  %v846_v31 = vmul.f32 %v3393_v15, %v3393_v15 }
 0x294   :  { %v3402_v8 = vsub.f32 %v3315_v34, %v815_v1  ;;  %v3405_v30 = vsub.f32 %v3321_v40, %v816_v4  ;;  %v871_v11 = vsel %vm758_vm1, %v845_v0, 0.0  ;;  %v874_v12 = vsel %vm758_vm1, %v846_v31, 0.0  ;;  %v1040_v1 = vld [vmem:[%s4036_s9 + $0x10] sm:$0xff]  ;;  %v1041_v4 = vld [vmem:[%s4036_s9 + $0x18] sm:$0xff] }
 0x295   :  { %v788_v10 = vpop.xlane.xlu0 %787  ;;  %v791_v21 = vpop.xlane.xlu1 %790  ;;  %872 = vadd.xlane.f32.xlu0 %v871_v11  ;;  %875 = vadd.xlane.f32.xlu1 %v874_v12 }
 0x296   :  { %v817_v32 = vmul.f32 0.015625, %v788_v10  ;;  %v818_v25 = vmul.f32 0.015625, %v791_v21  ;;  %v847_v28 = vmul.f32 %v3402_v8, %v3402_v8  ;;  %v848_v34 = vmul.f32 %v3405_v30, %v3405_v30 }
 0x298   :  { %v3414_v29 = vsub.f32 %v3323_v42, %v817_v32  ;;  %v3417_v40 = vsub.f32 %v3329_v48, %v818_v25  ;;  %v877_v36 = vsel %vm758_vm1, %v847_v28, 0.0  ;;  %v880_v2 = vsel %vm758_vm1, %v848_v34, 0.0  ;;  %v1042_v32 = vld [vmem:[%s4036_s9 + $0x20] sm:$0xff]  ;;  %v1043_v25 = vld [vmem:[%s4036_s9 + $0x28] sm:$0xff] }
 0x299   :  { %v794_v38 = vpop.xlane.xlu0 %793  ;;  %v797_v39 = vpop.xlane.xlu1 %796  ;;  %878 = vadd.xlane.f32.xlu0 %v877_v36  ;;  %881 = vadd.xlane.f32.xlu1 %v880_v2  ;;  %v1044_v36 = vld [vmem:[%s4036_s9 + $0x30] sm:$0xff]  ;;  %v1045_v2 = vld [vmem:[%s4036_s9 + $0x38] sm:$0xff] }
 0x29a   :  { %v819_v7 = vmul.f32 0.015625, %v794_v38  ;;  %v820_v44 = vmul.f32 0.015625, %v797_v39  ;;  %v849_v45 = vmul.f32 %v3414_v29, %v3414_v29  ;;  %v850_v42 = vmul.f32 %v3417_v40, %v3417_v40  ;;  %v1030_v39 = vld [vmem:[%s4035_s8] sm:$0xff] }
 0x29b   :  { %v2699_v38 = vpack.c.bf16 %v1045_v2, %v1044_v36 }
 0x29c   :  { %v3426_v14 = vsub.f32 %v3331_v50, %v819_v7  ;;  %v3429_v48 = vsub.f32 %v3337_v56, %v820_v44  ;;  %v883_v52 = vsel %vm758_vm1, %v849_v45, 0.0  ;;  %v886_v53 = vsel %vm758_vm1, %v850_v42, 0.0  ;;  %v1031_v7 = vld [vmem:[%s4035_s8 + $0x8] sm:$0xff] }
 0x29d   :  { %v800_v54 = vpop.xlane.xlu0 %799  ;;  %884 = vadd.xlane.f32.xlu0 %v883_v52  ;;  %887 = vadd.xlane.f32.xlu1 %v886_v53  ;;  %v803_v55 = vpop.xlane.xlu1 %802  ;;  %v3481_v44 = vpack.c.bf16 %v1031_v7, %v1030_v39 }
 0x29e   :  { %v821_v60 = vmul.f32 0.015625, %v800_v54  ;;  %v822_v61 = vmul.f32 0.015625, %v803_v55  ;;  %v851_v27 = vmul.f32 %v3426_v14, %v3426_v14  ;;  %v852_v50 = vmul.f32 %v3429_v48, %v3429_v48 }
 0x2a0   :  { %v3438_v63 = vsub.f32 %v3339_v58, %v821_v60  ;;  %v3441_v56 = vsub.f32 %v3345_v3, %v822_v61  ;;  %v889_v23 = vsel %vm758_vm1, %v851_v27, 0.0  ;;  %v892_v24 = vsel %vm758_vm1, %v852_v50, 0.0 }
 0x2a1   :  { %890 = vadd.xlane.f32.xlu0 %v889_v23  ;;  %v806_v0 = vpop.xlane.xlu0 %805  ;;  %893 = vadd.xlane.f32.xlu1 %v892_v24  ;;  %v2691_v58 = vpack.c.bf16 %v1041_v4, %v1040_v1 }
 0x2a2   :  { %v823_v31 = vmul.f32 0.015625, %v806_v0  ;;  %v853_v3 = vmul.f32 %v3438_v63, %v3438_v63  ;;  %v854_v11 = vmul.f32 %v3441_v56, %v3441_v56 }
 0x2a3   :  { %2692 = vmatprep.subr.bf16.mxu0 %v2691_v58 }
 0x2a4   :  { %v3456_v12 = vsub.f32 %v3347_v19, %v823_v31  ;;  %v895_v10 = vsel %vm758_vm1, %v853_v3, 0.0  ;;  %v898_v21 = vsel %vm758_vm1, %v854_v11, 0.0  ;;  %2694 = vmatpush3.bf16.msra.mxu0 %v2691_v58  ;;  %v2695_v19 = vpack.c.bf16 %v1043_v25, %v1042_v32 }
 0x2a5   :  { %896 = vadd.xlane.f32.xlu0 %v895_v10  ;;  %899 = vadd.xlane.f32.xlu1 %v898_v21  ;;  %v3487_v21 = vld [vmem:[%s4033_s6] ss:$0 sm:$0xff] }
 0x2a6   :  { %v855_v28 = vmul.f32 %v3456_v12, %v3456_v12  ;;  %2696 = vmatprep.subr.bf16.mxu0 %v2695_v19 }
 0x2a8   :  { %v901_v34 = vsel %vm758_vm1, %v855_v28, 0.0  ;;  %2698 = vmatpush3.bf16.msra.mxu0 %v2695_v19 }
 0x2a9   :  { %902 = vadd.xlane.f32.xlu0 %v901_v34  ;;  %2700 = vmatprep.subr.bf16.mxu0 %v2699_v38  ;;  %v3493_v34 = vld [vmem:[%s4034_s7] ss:$0 sm:$0xff] }
 0x2ac   :  { %2702 = vmatpush3.bf16.msra.mxu0 %v2699_v38 }
 0x2ad   :  { %2736 = vmatprep.subr.bf16.mxu0 %v3481_v44 }
 0x315   :  { %v861_v45 = vpop.xlane.xlu0 %860 }
 0x316   :  { %v905_v42 = vmul.f32 0.015625, %v861_v45  ;;  %v858_v52 = vpop.xlane.xlu1 %857 }
 0x317   :  { %v904_v53 = vmul.f32 0.015625, %v858_v52 }
 0x318   :  { %v921_v54 = vadd.f32 1e-05, %v905_v42 }
 0x319   :  { %v920_v55 = vadd.f32 1e-05, %v904_v53 }
 0x31a   :  { %2785 = vrsqrt.f32 %v921_v54  ;;  %v864_v60 = vpop.xlane.xlu1 %863 }
 0x31b   :  { %2787 = vrsqrt.f32 %v920_v55  ;;  %v906_v61 = vmul.f32 0.015625, %v864_v60 }
 0x31d   :  { %v922_v27 = vadd.f32 1e-05, %v906_v61 }
 0x31e   :  { %v867_v50 = vpop.xlane.xlu0 %866  ;;  %v870_v23 = vpop.xlane.xlu1 %869 }
 0x31f   :  { %2789 = vrsqrt.f32 %v922_v27  ;;  %v907_v24 = vmul.f32 0.015625, %v867_v50  ;;  %v908_v1 = vmul.f32 0.015625, %v870_v23  ;;  %v1032_v27 = vld [vmem:[%s4035_s8 + $0x10] sm:$0xff]  ;;  %v1033_v50 = vld [vmem:[%s4035_s8 + $0x18] sm:$0xff] }
 0x321   :  { %v923_v4 = vadd.f32 1e-05, %v907_v24  ;;  %v924_v0 = vadd.f32 1e-05, %v908_v1 }
 0x322   :  { %v873_v58 = vpop.xlane.xlu0 %872  ;;  %v876_v31 = vpop.xlane.xlu1 %875 }
 0x323   :  { %2791 = vrsqrt.f32 %v923_v4  ;;  %v909_v3 = vmul.f32 0.015625, %v873_v58  ;;  %v910_v11 = vmul.f32 0.015625, %v876_v31 }
 0x324   :  { %v2786_v10 = vpop.eup %2785  ;;  %2793 = vrsqrt.f32 %v924_v0 }
 0x325   :  { %v2788_v32 = vpop.eup %2787  ;;  %v953_v25 = vmul.f32 %v2786_v10, %v3362_v22  ;;  %v925_v28 = vadd.f32 1e-05, %v909_v3  ;;  %v926_v19 = vadd.f32 1e-05, %v910_v11  ;;  %v2739_v3 = vpack.c.bf16 %v1033_v50, %v1032_v27  ;;  %v1037_v50 = vld [vmem:[%s4035_s8 + $0x38] sm:$0xff] }
 0x326   :  { %v879_v36 = vpop.xlane.xlu0 %878  ;;  %v882_v2 = vpop.xlane.xlu1 %881  ;;  %v952_v38 = vmul.f32 %v2788_v32, %v3365_v26 }
 0x327   :  { %v976_v39 = vmul.f32 %v3487_v21, %v953_v25  ;;  %2795 = vrsqrt.f32 %v925_v28  ;;  %v911_v7 = vmul.f32 0.015625, %v879_v36  ;;  %v912_v45 = vmul.f32 0.015625, %v882_v2  ;;  %v1035_v36 = vld [vmem:[%s4035_s8 + $0x28] sm:$0xff] }
 0x328   :  { %2797 = vrsqrt.f32 %v926_v19  ;;  %v975_v42 = vmul.f32 %v3487_v21, %v952_v38  ;;  %v1034_v19 = vld [vmem:[%s4035_s8 + $0x20] sm:$0xff] }
 0x329   :  { %v2790_v22 = vpop.eup %2789  ;;  %v3499_v52 = vadd.f32 %v3493_v34, %v976_v39  ;;  %v927_v53 = vadd.f32 1e-05, %v911_v7  ;;  %v928_v54 = vadd.f32 1e-05, %v912_v45 }
 0x32a   :  { %v885_v55 = vpop.xlane.xlu0 %884  ;;  %v888_v60 = vpop.xlane.xlu1 %887  ;;  %v3502_v61 = vadd.f32 %v3493_v34, %v975_v42  ;;  %v954_v26 = vmul.f32 %v2790_v22, %v3373_v37 }
 0x32b   :  { %2799 = vrsqrt.f32 %v927_v53  ;;  %v913_v23 = vmul.f32 0.015625, %v885_v55  ;;  %v914_v24 = vmul.f32 0.015625, %v888_v60  ;;  %v1015_v58 = vmax.f32 %v3499_v52, 0.0 }
 0x32c   :  { %2801 = vrsqrt.f32 %v928_v54  ;;  %v1014_v1 = vmax.f32 %v3502_v61, 0.0  ;;  %v977_v4 = vmul.f32 %v3487_v21, %v954_v26  ;;  %v2743_v54 = vpack.c.bf16 %v1035_v36, %v1034_v19 }
 0x32d   :  { %v2792_v0 = vpop.eup %2791  ;;  %v929_v37 = vadd.f32 1e-05, %v913_v23  ;;  %v930_v31 = vadd.f32 1e-05, %v914_v24 }
 0x32e   :  { %v2794_v11 = vpop.eup %2793  ;;  %v891_v10 = vpop.xlane.xlu0 %890  ;;  %2487 = vmatprep.mubr.msk.f32.mxu0 %vm758_vm1, %v1014_v1  ;;  %v3518_v25 = vadd.f32 %v3493_v34, %v977_v4  ;;  %v955_v28 = vmul.f32 %v2792_v0, %v3379_v46 }
 0x32f   :  { %v894_v32 = vpop.xlane.xlu1 %893  ;;  %2803 = vrsqrt.f32 %v929_v37  ;;  %v915_v2 = vmul.f32 0.015625, %v891_v10  ;;  %2488 = vmatmul.mubr.msk.f32.vlgmr.msra.gmra.mrb[16].mxu0 %vm758_vm1, %v1015_v58  ;;  %v956_v39 = vmul.f32 %v2794_v11, %v3382_v47 }
 0x330   :  { %v916_v38 = vmul.f32 0.015625, %v894_v32  ;;  %2805 = vrsqrt.f32 %v930_v31  ;;  %v1016_v46 = vmax.f32 %v3518_v25, 0.0  ;;  %v978_v7 = vmul.f32 %v3487_v21, %v955_v28  ;;  %2738 = vmatpush3.bf16.msra.mxu0 %v3481_v44  ;;  %v1036_v44 = vld [vmem:[%s4035_s8 + $0x30] sm:$0xff] }
 0x331   :  { %v2796_v45 = vpop.eup %2795  ;;  %v931_v42 = vadd.f32 1e-05, %v915_v2  ;;  %v979_v53 = vmul.f32 %v3487_v21, %v956_v39  ;;  %2740 = vmatprep.subr.bf16.mxu0 %v2739_v3  ;;  %v2747_v28 = vpack.c.bf16 %v1037_v50, %v1036_v44 }
 0x332   :  { %v932_v22 = vadd.f32 1e-05, %v916_v38  ;;  %v2798_v55 = vpop.eup %2797  ;;  %v897_v60 = vpop.xlane.xlu0 %896  ;;  %2490 = vmatprep.mubr.msk.f32.mxu0 %vm758_vm1, %v1016_v46  ;;  %v3539_v26 = vadd.f32 %v3493_v34, %v978_v7  ;;  %v957_v27 = vmul.f32 %v2796_v45, %v3390_v62 }
 0x333   :  { %v900_v47 = vpop.xlane.xlu1 %899  ;;  %2807 = vrsqrt.f32 %v931_v42  ;;  %v917_v23 = vmul.f32 0.015625, %v897_v60  ;;  %v3549_v4 = vadd.f32 %v3493_v34, %v979_v53  ;;  %v958_v62 = vmul.f32 %v2798_v55, %v3393_v15 }
 0x334   :  { %v918_v24 = vmul.f32 0.015625, %v900_v47  ;;  %2809 = vrsqrt.f32 %v932_v22  ;;  %v1017_v0 = vmax.f32 %v3539_v26, 0.0  ;;  %v980_v37 = vmul.f32 %v3487_v21, %v957_v27  ;;  %2742 = vmatpush3.bf16.msra.mxu0 %v2739_v3 }
 0x335   :  { %v2800_v31 = vpop.eup %2799  ;;  %v933_v11 = vadd.f32 1e-05, %v917_v23  ;;  %v1018_v32 = vmax.f32 %v3549_v4, 0.0  ;;  %2744 = vmatprep.subr.bf16.mxu0 %v2743_v54  ;;  %v981_v38 = vmul.f32 %v3487_v21, %v958_v62 }
 0x336   :  { %v934_v10 = vadd.f32 1e-05, %v918_v24  ;;  %v2802_v19 = vpop.eup %2801  ;;  %v903_v36 = vpop.xlane.xlu0 %902  ;;  %2491 = vmatmul.mubr.msk.f32.gmra.mrb[18].mxu0 %vm758_vm1, %v1017_v0  ;;  %v3559_v2 = vadd.f32 %v3493_v34, %v980_v37  ;;  %v959_v15 = vmul.f32 %v2800_v31, %v3402_v8 }
 0x337   :  { %2811 = vrsqrt.f32 %v933_v11  ;;  %v919_v3 = vmul.f32 0.015625, %v903_v36  ;;  %2493 = vmatprep.mubr.msk.f32.mxu0 %vm758_vm1, %v1018_v32  ;;  %v960_v39 = vmul.f32 %v2802_v19, %v3405_v30  ;;  %v3569_v45 = vadd.f32 %v3493_v34, %v981_v38 }
 0x338   :  { %2813 = vrsqrt.f32 %v934_v10  ;;  %v1019_v7 = vmax.f32 %v3559_v2, 0.0  ;;  %v982_v42 = vmul.f32 %v3487_v21, %v959_v15  ;;  %2746 = vmatpush3.bf16.msra.mxu0 %v2743_v54 }
 0x339   :  { %v2804_v22 = vpop.eup %2803  ;;  %v935_v53 = vadd.f32 1e-05, %v919_v3  ;;  %v983_v8 = vmul.f32 %v3487_v21, %v960_v39  ;;  %2748 = vmatprep.subr.bf16.mxu0 %v2747_v28  ;;  %v1020_v30 = vmax.f32 %v3569_v45, 0.0 }
 0x33a   :  { %v2806_v55 = vpop.eup %2805  ;;  %2494 = vmatmul.mubr.msk.f32.gmra.mrb[20].mxu0 %vm758_vm1, %v1019_v7  ;;  %v1005_v60 = vadd.f32 %v3493_v34, %v982_v42  ;;  %v961_v47 = vmul.f32 %v2804_v22, %v3414_v29 }
 0x33b   :  { %2815 = vrsqrt.f32 %v935_v53  ;;  %v1006_v27 = vadd.f32 %v3493_v34, %v983_v8  ;;  %v962_v54 = vmul.f32 %v2806_v55, %v3417_v40  ;;  %2496 = vmatprep.mubr.msk.f32.mxu0 %vm758_vm1, %v1020_v30 }
 0x33c   :  { %v1021_v44 = vmax.f32 %v1005_v60, 0.0  ;;  %v984_v50 = vmul.f32 %v3487_v21, %v961_v47  ;;  %2750 = vmatpush3.bf16.msra.mxu0 %v2747_v28 }
 0x33d   :  { %v2808_v23 = vpop.eup %2807  ;;  %v1022_v24 = vmax.f32 %v1006_v27, 0.0  ;;  %v985_v37 = vmul.f32 %v3487_v21, %v962_v54 }
 0x33e   :  { %v2810_v62 = vpop.eup %2809  ;;  %2497 = vmatmul.mubr.msk.f32.gmra.mrb[22].mxu0 %vm758_vm1, %v1021_v44  ;;  %v1007_v29 = vadd.f32 %v3493_v34, %v984_v50  ;;  %v963_v31 = vmul.f32 %v2808_v23, %v3426_v14 }
 0x33f   :  { %2499 = vmatprep.mubr.msk.f32.mxu0 %vm758_vm1, %v1022_v24  ;;  %v1008_v40 = vadd.f32 %v3493_v34, %v985_v37  ;;  %v964_v11 = vmul.f32 %v2810_v62, %v3429_v48 }
 0x340   :  { %v1023_v10 = vmax.f32 %v1007_v29, 0.0  ;;  %v986_v28 = vmul.f32 %v3487_v21, %v963_v31 }
 0x341   :  { %v2812_v19 = vpop.eup %2811  ;;  %v1024_v36 = vmax.f32 %v1008_v40, 0.0  ;;  %v987_v38 = vmul.f32 %v3487_v21, %v964_v11 }
 0x342   :  { %v2814_v15 = vpop.eup %2813  ;;  %2500 = vmatmul.mubr.msk.f32.gmra.mrb[24].mxu0 %vm758_vm1, %v1023_v10  ;;  %v1009_v3 = vadd.f32 %v3493_v34, %v986_v28  ;;  %v965_v14 = vmul.f32 %v2812_v19, %v3438_v63  ;;  %v2849_v28 = vld [vmem:[%s4027_s0 + $0x8] sm:$0xff] }
 0x343   :  { %2502 = vmatprep.mubr.msk.f32.mxu0 %vm758_vm1, %v1024_v36  ;;  %v1010_v39 = vadd.f32 %v3493_v34, %v987_v38  ;;  %v966_v48 = vmul.f32 %v2814_v15, %v3441_v56  ;;  %v2850_v38 = vld [vmem:[%s4027_s0 + $0x10] sm:$0xff]  ;;  %v2851_v15 = vld [vmem:[%s4027_s0 + $0x18] sm:$0xff] }
 0x344   :  { %v1025_v45 = vmax.f32 %v1009_v3, 0.0  ;;  %v988_v42 = vmul.f32 %v3487_v21, %v965_v14 }
 0x345   :  { %v2816_v22 = vpop.eup %2815  ;;  %v1026_v53 = vmax.f32 %v1010_v39, 0.0  ;;  %v989_v8 = vmul.f32 %v3487_v21, %v966_v48  ;;  %v2852_v39 = vld [vmem:[%s4027_s0 + $0x20] sm:$0xff]  ;;  %v2853_v48 = vld [vmem:[%s4027_s0 + $0x28] sm:$0xff] }
 0x346   :  { %2503 = vmatmul.mubr.msk.f32.gmra.mrb[26].mxu0 %vm758_vm1, %v1025_v45  ;;  %v1011_v55 = vadd.f32 %v3493_v34, %v988_v42  ;;  %v967_v60 = vmul.f32 %v2816_v22, %v3456_v12  ;;  %v2854_v22 = vld [vmem:[%s4027_s0 + $0x30] sm:$0xff] }
 0x347   :  { %2505 = vmatprep.mubr.msk.f32.mxu0 %vm758_vm1, %v1026_v53  ;;  %v1012_v63 = vadd.f32 %v3493_v34, %v989_v8 }
 0x348   :  { %v1027_v47 = vmax.f32 %v1011_v55, 0.0  ;;  %v990_v56 = vmul.f32 %v3487_v21, %v967_v60  ;;  %v2856_v60 = vld [vmem:[%s4027_s0 + $0x40] sm:$0xff] }
 0x349   :  { %v1028_v27 = vmax.f32 %v1012_v63, 0.0  ;;  %v2857_v63 = vld [vmem:[%s4027_s0 + $0x48] sm:$0xff] }
 0x34a   :  { %2506 = vmatmul.mubr.msk.f32.gmra.mrb[28].mxu0 %vm758_vm1, %v1027_v47  ;;  %v1013_v54 = vadd.f32 %v3493_v34, %v990_v56 }
 0x34b   :  { %2508 = vmatprep.mubr.msk.f32.mxu0 %vm758_vm1, %v1028_v27 }
 0x34c   :  { %v1029_v50 = vmax.f32 %v1013_v54, 0.0  ;;  %v2859_v54 = vld [vmem:[%s4027_s0 + $0x58] sm:$0xff] }
 0x34e   :  { %2509 = vmatmul.mubr.msk.f32.gmra.mrb[30].mxu0 %vm758_vm1, %v1029_v50 }
 0x34f   :  { %2583 = vmatprep.mubr.msk.f32.mxu0 %vm758_vm1, %v1014_v1 }
 0x352   :  { %2584 = vmatmul.mubr.msk.f32.vlgmr.msra.gmra.mrb[32].mxu0 %vm758_vm1, %v1015_v58 }
 0x353   :  { %2586 = vmatprep.mubr.msk.f32.mxu0 %vm758_vm1, %v1016_v46 }
 0x356   :  { %2587 = vmatmul.mubr.msk.f32.gmra.mrb[34].mxu0 %vm758_vm1, %v1017_v0 }
 0x357   :  { %2589 = vmatprep.mubr.msk.f32.mxu0 %vm758_vm1, %v1018_v32 }
 0x35a   :  { %2590 = vmatmul.mubr.msk.f32.gmra.mrb[36].mxu0 %vm758_vm1, %v1019_v7 }
 0x35b   :  { %2592 = vmatprep.mubr.msk.f32.mxu0 %vm758_vm1, %v1020_v30 }
 0x35e   :  { %2593 = vmatmul.mubr.msk.f32.gmra.mrb[38].mxu0 %vm758_vm1, %v1021_v44 }
 0x35f   :  { %2595 = vmatprep.mubr.msk.f32.mxu0 %vm758_vm1, %v1022_v24 }
 0x362   :  { %2596 = vmatmul.mubr.msk.f32.gmra.mrb[40].mxu0 %vm758_vm1, %v1023_v10 }
 0x363   :  { %2598 = vmatprep.mubr.msk.f32.mxu0 %vm758_vm1, %v1024_v36 }
 0x366   :  { %2599 = vmatmul.mubr.msk.f32.gmra.mrb[42].mxu0 %vm758_vm1, %v1025_v45 }
 0x367   :  { %2601 = vmatprep.mubr.msk.f32.mxu0 %vm758_vm1, %v1026_v53  ;;  %v2855_v53 = vld [vmem:[%s4027_s0 + $0x38] sm:$0xff] }
 0x36a   :  { %2602 = vmatmul.mubr.msk.f32.gmra.mrb[44].mxu0 %vm758_vm1, %v1027_v47 }
 0x36b   :  { %2604 = vmatprep.mubr.msk.f32.mxu0 %vm758_vm1, %v1028_v27  ;;  %v2858_v27 = vld [vmem:[%s4027_s0 + $0x50] sm:$0xff] }
 0x36e   :  { %2605 = vmatmul.mubr.msk.f32.gmra.mrb[46].mxu0 %vm758_vm1, %v1029_v50 }
 0x402   :  { %v2489_v12 = vpop.f32.mrb[16].mxu0 }
 0x403   :  { %v1160_v21 = vpop.f32.mrb[17].mxu0 }
 0x404   :  { %v2703_v34 = vpack.c.bf16 %v2489_v12, %v1160_v21  ;;  %v2860_v21 = vld [vmem:[%s4027_s0 + $0x60] sm:$0xff] }
 0x406   :  { %2704 = vmatprep.subr.bf16.mxu1 %v2703_v34 }
 0x407   :  { %2706 = vmatpush3.bf16.msra.mxu1 %v2703_v34  ;;  %v2861_v34 = vld [vmem:[%s4027_s0 + $0x68] sm:$0xff] }
 0x409   :  { %v2492_v52 = vpop.f32.mrb[18].mxu0 }
 0x40a   :  { %v1170_v61 = vpop.f32.mrb[19].mxu0 }
 0x40b   :  { %v2707_v1 = vpack.c.bf16 %v2492_v52, %v1170_v61 }
 0x40d   :  { %v2495_v58 = vpop.f32.mrb[20].mxu0  ;;  %2708 = vmatprep.subr.bf16.mxu1 %v2707_v1 }
 0x40e   :  { %v1180_v25 = vpop.f32.mrb[21].mxu0  ;;  %2710 = vmatpush3.bf16.msra.mxu1 %v2707_v1  ;;  %v2862_v1 = vld [vmem:[%s4027_s0 + $0x70] sm:$0xff] }
 0x40f   :  { %v2711_v46 = vpack.c.bf16 %v2495_v58, %v1180_v25  ;;  %v2863_v58 = vld [vmem:[%s4027_s0 + $0x78] sm:$0xff] }
 0x411   :  { %v2498_v26 = vpop.f32.mrb[22].mxu0  ;;  %2712 = vmatprep.subr.bf16.mxu1 %v2711_v46 }
 0x412   :  { %v1190_v4 = vpop.f32.mrb[23].mxu0  ;;  %2714 = vmatpush3.bf16.msra.mxu1 %v2711_v46 }
 0x413   :  { %v2715_v0 = vpack.c.bf16 %v2498_v26, %v1190_v4 }
 0x415   :  { %v2501_v32 = vpop.f32.mrb[24].mxu0  ;;  %2716 = vmatprep.subr.bf16.mxu1 %v2715_v0 }
 0x416   :  { %v1200_v2 = vpop.f32.mrb[25].mxu0  ;;  %2718 = vmatpush3.bf16.msra.mxu1 %v2715_v0 }
 0x417   :  { %v2719_v7 = vpack.c.bf16 %v2501_v32, %v1200_v2 }
 0x419   :  { %v2504_v30 = vpop.f32.mrb[26].mxu0  ;;  %2720 = vmatprep.subr.bf16.mxu1 %v2719_v7 }
 0x41a   :  { %v1210_v44 = vpop.f32.mrb[27].mxu0  ;;  %2722 = vmatpush3.bf16.msra.mxu1 %v2719_v7 }
 0x41b   :  { %v2723_v23 = vpack.c.bf16 %v2504_v30, %v1210_v44 }
 0x41d   :  { %v2507_v24 = vpop.f32.mrb[28].mxu0  ;;  %2724 = vmatprep.subr.bf16.mxu1 %v2723_v23 }
 0x41e   :  { %v1220_v37 = vpop.f32.mrb[29].mxu0  ;;  %2726 = vmatpush3.bf16.msra.mxu1 %v2723_v23 }
 0x41f   :  { %v2727_v62 = vpack.c.bf16 %v2507_v24, %v1220_v37 }
 0x421   :  { %v2510_v29 = vpop.f32.mrb[30].mxu0  ;;  %2728 = vmatprep.subr.bf16.mxu1 %v2727_v62 }
 0x422   :  { %v1230_v31 = vpop.f32.mrb[31].mxu0  ;;  %2730 = vmatpush3.bf16.msra.mxu1 %v2727_v62 }
 0x423   :  { %v2731_v40 = vpack.c.bf16 %v2510_v29, %v1230_v31 }
 0x425   :  { %2732 = vmatprep.subr.bf16.mxu1 %v2731_v40  ;;  %v2585_v11 = vpop.f32.mrb[32].mxu0 }
 0x426   :  { %2734 = vmatpush3.bf16.msra.mxu1 %v2731_v40  ;;  %v1466_v10 = vpop.f32.mrb[33].mxu0 }
 0x429   :  { %2544 = vmatmul.mubr.f32.vlgmr.msra.gmra.mrb[16].mxu1 %v2849_v28  ;;  %v2588_v19 = vpop.f32.mrb[34].mxu0 }
 0x42a   :  { %v1476_v36 = vpop.f32.mrb[35].mxu0  ;;  %2546 = vmatprep.mubr.f32.mxu1 %v2850_v38 }
 0x42d   :  { %2547 = vmatmul.mubr.f32.gmra.mrb[18].mxu1 %v2851_v15  ;;  %v2591_v3 = vpop.f32.mrb[36].mxu0 }
 0x42e   :  { %v1486_v14 = vpop.f32.mrb[37].mxu0  ;;  %2549 = vmatprep.mubr.f32.mxu1 %v2852_v39 }
 0x431   :  { %2550 = vmatmul.mubr.f32.gmra.mrb[20].mxu1 %v2853_v48  ;;  %v2594_v45 = vpop.f32.mrb[38].mxu0 }
 0x432   :  { %v1496_v42 = vpop.f32.mrb[39].mxu0  ;;  %2552 = vmatprep.mubr.f32.mxu1 %v2854_v22 }
 0x435   :  { %2553 = vmatmul.mubr.f32.gmra.mrb[22].mxu1 %v2855_v53  ;;  %v3659_v8 = vpop.f32.mrb[40].mxu0 }
 0x436   :  { %v3661_v55 = vpop.f32.mrb[41].mxu0  ;;  %2555 = vmatprep.mubr.f32.mxu1 %v2856_v60 }
 0x439   :  { %2556 = vmatmul.mubr.f32.gmra.mrb[24].mxu1 %v2857_v63  ;;  %v3669_v47 = vpop.f32.mrb[42].mxu0 }
 0x43a   :  { %v3671_v56 = vpop.f32.mrb[43].mxu0  ;;  %2558 = vmatprep.mubr.f32.mxu1 %v2858_v27 }
 0x43d   :  { %2559 = vmatmul.mubr.f32.gmra.mrb[26].mxu1 %v2859_v54  ;;  %v3679_v50 = vpop.f32.mrb[44].mxu0 }
 0x43e   :  { %v3681_v12 = vpop.f32.mrb[45].mxu0  ;;  %2561 = vmatprep.mubr.f32.mxu1 %v2860_v21 }
 0x441   :  { %2562 = vmatmul.mubr.f32.gmra.mrb[28].mxu1 %v2861_v34  ;;  %v3689_v52 = vpop.f32.mrb[46].mxu0 }
 0x442   :  { %v3691_v61 = vpop.f32.mrb[47].mxu0  ;;  %2564 = vmatprep.mubr.f32.mxu1 %v2862_v1 }
 0x445   :  { %2565 = vmatmul.mubr.f32.gmra.mrb[30].mxu1 %v2863_v58 }
 0x4fc   :  { %v2545_v25 = vpop.f32.mrb[16].mxu1 }
 0x4fd   :  { %v1385_v46 = vmul.f32 %v2545_v25, %v3189_v13  ;;  %v1305_v26 = vpop.f32.mrb[17].mxu1  ;;  %v3710_v13 = vld [vmem:[%s4037_s10] ss:$0 sm:$0xff] }
 0x4fe   :  { %v1384_v4 = vmul.f32 %v1305_v26, %v3185_v6 }
 0x4ff   :  { %v3701_v0 = vadd.f32 %v2585_v11, %v1385_v46 }
 0x500   :  { %v3703_v32 = vadd.f32 %v1466_v10, %v1384_v4  ;;  %v2548_v2 = vpop.f32.mrb[18].mxu1 }
 0x501   :  { %v1387_v7 = vmul.f32 %v2548_v2, %v3191_v16  ;;  %v1315_v30 = vpop.f32.mrb[19].mxu1 }
 0x502   :  { %v1386_v44 = vmul.f32 %v1315_v30, %v3187_v9 }
 0x503   :  { %v1482_v23 = vadd.f32 %v2588_v19, %v1387_v7 }
 0x504   :  { %v1477_v24 = vadd.f32 %v1476_v36, %v1386_v44  ;;  %v2551_v37 = vpop.f32.mrb[20].mxu1 }
 0x505   :  { %v1389_v6 = vmul.f32 %v2551_v37, %v3195_v18  ;;  %v1325_v62 = vpop.f32.mrb[21].mxu1  ;;  %v3714_v29 = vadd.f32 %v3710_v13, %v1482_v23 }
 0x506   :  { %v1388_v31 = vmul.f32 %v1325_v62, %v3193_v17  ;;  %v3718_v16 = vadd.f32 %v3710_v13, %v1477_v24  ;;  %v3794_v62 = vadd.f32 %v3710_v13, %v3703_v32 }
 0x507   :  { %v1492_v9 = vadd.f32 %v2591_v3, %v1389_v6  ;;  %v1577_v40 = vsel %vm348_vm0, %v3714_v29, 0.0 }
 0x508   :  { %v1487_v11 = vadd.f32 %v1486_v14, %v1388_v31  ;;  %1578 = vadd.xlane.f32.xlu0 %v1577_v40  ;;  %v2554_v10 = vpop.f32.mrb[22].mxu1  ;;  %v1574_v28 = vsel %vm348_vm0, %v3718_v16, 0.0 }
 0x509   :  { %v1391_v18 = vmul.f32 %v2554_v10, %v3209_v35  ;;  %1575 = vadd.xlane.f32.xlu1 %v1574_v28  ;;  %v1335_v19 = vpop.f32.mrb[23].mxu1  ;;  %v3726_v36 = vadd.f32 %v3710_v13, %v1492_v9 }
 0x50a   :  { %v1390_v17 = vmul.f32 %v1335_v19, %v3206_v33  ;;  %v3730_v38 = vadd.f32 %v3710_v13, %v1487_v11  ;;  %v1839_v11 = vld [vmem:[%s4040_s13] sm:$0xff] }
 0x50b   :  { %v1502_v15 = vadd.f32 %v2594_v45, %v1391_v18  ;;  %v1583_v3 = vsel %vm348_vm0, %v3726_v36, 0.0 }
 0x50c   :  { %v1497_v14 = vadd.f32 %v1496_v42, %v1390_v17  ;;  %1584 = vadd.xlane.f32.xlu0 %v1583_v3  ;;  %v2557_v39 = vpop.f32.mrb[24].mxu1  ;;  %v1580_v35 = vsel %vm348_vm0, %v3730_v38, 0.0 }
 0x50d   :  { %v1393_v48 = vmul.f32 %v2557_v39, %v3219_v43  ;;  %1581 = vadd.xlane.f32.xlu1 %v1580_v35  ;;  %v1345_v22 = vpop.f32.mrb[25].mxu1  ;;  %v3738_v53 = vadd.f32 %v3710_v13, %v1502_v15 }
 0x50e   :  { %v1392_v33 = vmul.f32 %v1345_v22, %v3216_v41  ;;  %v3742_v45 = vadd.f32 %v3710_v13, %v1497_v14 }
 0x50f   :  { %v1512_v60 = vadd.f32 %v3659_v8, %v1393_v48  ;;  %v1589_v42 = vsel %vm348_vm0, %v3738_v53, 0.0 }
 0x510   :  { %v1507_v63 = vadd.f32 %v3661_v55, %v1392_v33  ;;  %1590 = vadd.xlane.f32.xlu0 %v1589_v42  ;;  %v2560_v27 = vpop.f32.mrb[26].mxu1  ;;  %v1586_v43 = vsel %vm348_vm0, %v3742_v45, 0.0 }
 0x511   :  { %v1395_v54 = vmul.f32 %v2560_v27, %v3229_v51  ;;  %1587 = vadd.xlane.f32.xlu1 %v1586_v43  ;;  %v1355_v21 = vpop.f32.mrb[27].mxu1  ;;  %v3752_v41 = vadd.f32 %v3710_v13, %v1512_v60 }
 0x512   :  { %v1394_v34 = vmul.f32 %v1355_v21, %v3226_v49  ;;  %v3756_v8 = vadd.f32 %v3710_v13, %v1507_v63 }
 0x513   :  { %v1522_v1 = vadd.f32 %v3669_v47, %v1395_v54  ;;  %v1595_v55 = vsel %vm348_vm0, %v3752_v41, 0.0 }
 0x514   :  { %v1517_v58 = vadd.f32 %v3671_v56, %v1394_v34  ;;  %1596 = vadd.xlane.f32.xlu0 %v1595_v55  ;;  %v2563_v25 = vpop.f32.mrb[28].mxu1  ;;  %v1592_v51 = vsel %vm348_vm0, %v3756_v8, 0.0 }
 0x515   :  { %v1397_v46 = vmul.f32 %v2563_v25, %v3239_v59  ;;  %1593 = vadd.xlane.f32.xlu1 %v1592_v51  ;;  %v1365_v26 = vpop.f32.mrb[29].mxu1  ;;  %v3766_v49 = vadd.f32 %v3710_v13, %v1522_v1 }
 0x516   :  { %v1396_v4 = vmul.f32 %v1365_v26, %v3236_v57  ;;  %v3770_v47 = vadd.f32 %v3710_v13, %v1517_v58 }
 0x517   :  { %v1532_v2 = vadd.f32 %v3679_v50, %v1397_v46  ;;  %v1601_v56 = vsel %vm348_vm0, %v3766_v49, 0.0 }
 0x518   :  { %v1527_v7 = vadd.f32 %v3681_v12, %v1396_v4  ;;  %1602 = vadd.xlane.f32.xlu0 %v1601_v56  ;;  %v2566_v30 = vpop.f32.mrb[30].mxu1  ;;  %v1598_v59 = vsel %vm348_vm0, %v3770_v47, 0.0 }
 0x519   :  { %v1399_v44 = vmul.f32 %v2566_v30, %v3249_v20  ;;  %1599 = vadd.xlane.f32.xlu1 %v1598_v59  ;;  %v1375_v23 = vpop.f32.mrb[31].mxu1  ;;  %v3780_v57 = vadd.f32 %v3710_v13, %v1532_v2 }
 0x51a   :  { %v1398_v24 = vmul.f32 %v1375_v23, %v3246_v5  ;;  %v3784_v50 = vadd.f32 %v3710_v13, %v1527_v7 }
 0x51b   :  { %v1542_v37 = vadd.f32 %v3689_v52, %v1399_v44  ;;  %v1607_v12 = vsel %vm348_vm0, %v3780_v57, 0.0  ;;  %v1568_v52 = vsel %vm348_vm0, %v3794_v62, 0.0 }
 0x51c   :  { %v1537_v6 = vadd.f32 %v3691_v61, %v1398_v24  ;;  %1608 = vadd.xlane.f32.xlu0 %v1607_v12  ;;  %v1604_v20 = vsel %vm348_vm0, %v3784_v50, 0.0  ;;  %v3805_v61 = vadd.f32 %v3710_v13, %v3701_v0  ;;  %v1840_v0 = vld [vmem:[%s4040_s13 + $0x8] sm:$0xff] }
 0x51d   :  { %1605 = vadd.xlane.f32.xlu1 %v1604_v20  ;;  %v3808_v9 = vadd.f32 %v3710_v13, %v1542_v37 }
 0x51e   :  { %v3797_v5 = vadd.f32 %v3710_v13, %v1537_v6  ;;  %v1571_v32 = vsel %vm348_vm0, %v3805_v61, 0.0  ;;  %v2751_v13 = vpack.c.bf16 %v1840_v0, %v1839_v11 }
 0x51f   :  { %v1613_v40 = vsel %vm348_vm0, %v3808_v9, 0.0 }
 0x520   :  { %v1610_v31 = vsel %vm348_vm0, %v3797_v5, 0.0  ;;  %2759 = vmatprep.subr.bf16.mxu1 %v2751_v13  ;;  %2752 = vmatprep.subr.bf16.mxu0 %v2751_v13 }
 0x521   :  { %1569 = vadd.xlane.f32.xlu1 %v1568_v52  ;;  %1611 = vadd.xlane.f32.xlu0 %v1610_v31 }
 0x522   :  { %2761 = vmatpush3.bf16.msra.mxu1 %v2751_v13  ;;  %2754 = vmatpush3.bf16.msra.mxu0 %v2751_v13 }
 0x525   :  { %1572 = vadd.xlane.f32.xlu1 %v1571_v32  ;;  %1614 = vadd.xlane.f32.xlu0 %v1613_v40 }
 0x595   :  { %v1579_v10 = vpop.xlane.xlu0 %1578 }
 0x596   :  { %v1620_v28 = vmul.f32 0.03125, %v1579_v10  ;;  %v1576_v18 = vpop.xlane.xlu1 %1575 }
 0x597   :  { %v1619_v19 = vmul.f32 0.03125, %v1576_v18 }
 0x598   :  { %v3821_v17 = vsub.f32 %v3714_v29, %v1620_v28 }
 0x599   :  { %v3824_v15 = vsub.f32 %v3718_v16, %v1619_v19  ;;  %v1585_v3 = vpop.xlane.xlu0 %1584 }
 0x59a   :  { %v1622_v14 = vmul.f32 0.03125, %v1585_v3  ;;  %v1582_v39 = vpop.xlane.xlu1 %1581  ;;  %v1652_v35 = vmul.f32 %v3821_v17, %v3821_v17 }
 0x59b   :  { %v1621_v48 = vmul.f32 0.03125, %v1582_v39  ;;  %v1651_v22 = vmul.f32 %v3824_v15, %v3824_v15 }
 0x59c   :  { %v3831_v33 = vsub.f32 %v3726_v36, %v1622_v14  ;;  %v1674_v60 = vsel %vm348_vm0, %v1652_v35, 0.0 }
 0x59d   :  { %v3835_v29 = vsub.f32 %v3730_v38, %v1621_v48  ;;  %v1591_v16 = vpop.xlane.xlu0 %1590  ;;  %1675 = vadd.xlane.f32.xlu0 %v1674_v60  ;;  %v1671_v42 = vsel %vm348_vm0, %v1651_v22, 0.0 }
 0x59e   :  { %v1624_v63 = vmul.f32 0.03125, %v1591_v16  ;;  %v1588_v27 = vpop.xlane.xlu1 %1587  ;;  %1672 = vadd.xlane.f32.xlu1 %v1671_v42  ;;  %v1654_v43 = vmul.f32 %v3831_v33, %v3831_v33 }
 0x59f   :  { %v1623_v54 = vmul.f32 0.03125, %v1588_v27  ;;  %v1653_v36 = vmul.f32 %v3835_v29, %v3835_v29 }
 0x5a0   :  { %v3843_v21 = vsub.f32 %v3738_v53, %v1624_v63  ;;  %v1680_v38 = vsel %vm348_vm0, %v1654_v43, 0.0 }
 0x5a1   :  { %v3847_v34 = vsub.f32 %v3742_v45, %v1623_v54  ;;  %v1597_v1 = vpop.xlane.xlu0 %1596  ;;  %1681 = vadd.xlane.f32.xlu0 %v1680_v38  ;;  %v1677_v55 = vsel %vm348_vm0, %v1653_v36, 0.0  ;;  %v1842_v36 = vld [vmem:[%s4040_s13 + $0x18] sm:$0xff] }
 0x5a2   :  { %v1626_v58 = vmul.f32 0.03125, %v1597_v1  ;;  %v1594_v25 = vpop.xlane.xlu1 %1593  ;;  %1678 = vadd.xlane.f32.xlu1 %v1677_v55  ;;  %v1656_v51 = vmul.f32 %v3843_v21, %v3843_v21 }
 0x5a3   :  { %v1625_v46 = vmul.f32 0.03125, %v1594_v25  ;;  %v1655_v53 = vmul.f32 %v3847_v34, %v3847_v34 }
 0x5a4   :  { %v3855_v26 = vsub.f32 %v3752_v41, %v1626_v58  ;;  %v1686_v45 = vsel %vm348_vm0, %v1656_v51, 0.0 }
 0x5a5   :  { %v3859_v4 = vsub.f32 %v3756_v8, %v1625_v46  ;;  %v1603_v2 = vpop.xlane.xlu0 %1602  ;;  %1687 = vadd.xlane.f32.xlu0 %v1686_v45  ;;  %v1683_v56 = vsel %vm348_vm0, %v1655_v53, 0.0 }
 0x5a6   :  { %v1628_v7 = vmul.f32 0.03125, %v1603_v2  ;;  %v1600_v30 = vpop.xlane.xlu1 %1599  ;;  %1684 = vadd.xlane.f32.xlu1 %v1683_v56  ;;  %v1658_v59 = vmul.f32 %v3855_v26, %v3855_v26 }
 0x5a7   :  { %v1627_v44 = vmul.f32 0.03125, %v1600_v30  ;;  %v1657_v41 = vmul.f32 %v3859_v4, %v3859_v4 }
 0x5a8   :  { %v3867_v23 = vsub.f32 %v3766_v49, %v1628_v7  ;;  %v1692_v8 = vsel %vm348_vm0, %v1658_v59, 0.0 }
 0x5a9   :  { %v3871_v24 = vsub.f32 %v3770_v47, %v1627_v44  ;;  %v1609_v37 = vpop.xlane.xlu0 %1608  ;;  %1693 = vadd.xlane.f32.xlu0 %v1692_v8  ;;  %v1689_v12 = vsel %vm348_vm0, %v1657_v41, 0.0 }
 0x5aa   :  { %v1630_v6 = vmul.f32 0.03125, %v1609_v37  ;;  %1690 = vadd.xlane.f32.xlu1 %v1689_v12  ;;  %v1606_v20 = vpop.xlane.xlu1 %1605  ;;  %v1660_v52 = vmul.f32 %v3867_v23, %v3867_v23 }
 0x5ab   :  { %v1629_v31 = vmul.f32 0.03125, %v1606_v20  ;;  %v1659_v49 = vmul.f32 %v3871_v24, %v3871_v24 }
 0x5ac   :  { %v3879_v32 = vsub.f32 %v3780_v57, %v1630_v6  ;;  %v1698_v47 = vsel %vm348_vm0, %v1660_v52, 0.0 }
 0x5ad   :  { %v3883_v40 = vsub.f32 %v3784_v50, %v1629_v31  ;;  %1699 = vadd.xlane.f32.xlu0 %v1698_v47  ;;  %v1695_v11 = vsel %vm348_vm0, %v1659_v49, 0.0  ;;  %v3925_v47 = vld [vmem:[%s4038_s11] ss:$0 sm:$0xff] }
 0x5ae   :  { %1696 = vadd.xlane.f32.xlu1 %v1695_v11  ;;  %v1570_v0 = vpop.xlane.xlu1 %1569  ;;  %v1612_v13 = vpop.xlane.xlu0 %1611  ;;  %v1662_v10 = vmul.f32 %v3879_v32, %v3879_v32 }
 0x5af   :  { %v1617_v28 = vmul.f32 0.03125, %v1570_v0  ;;  %v1631_v18 = vmul.f32 0.03125, %v1612_v13  ;;  %v1661_v57 = vmul.f32 %v3883_v40, %v3883_v40 }
 0x5b0   :  { %v1704_v19 = vsel %vm348_vm0, %v1662_v10, 0.0 }
 0x5b1   :  { %v3892_v3 = vsub.f32 %v3794_v62, %v1617_v28  ;;  %v3895_v50 = vsub.f32 %v3797_v5, %v1631_v18  ;;  %1705 = vadd.xlane.f32.xlu0 %v1704_v19  ;;  %v1701_v14 = vsel %vm348_vm0, %v1661_v57, 0.0  ;;  %v3931_v18 = vld [vmem:[%s4039_s12] ss:$0 sm:$0xff] }
 0x5b2   :  { %1702 = vadd.xlane.f32.xlu1 %v1701_v14  ;;  %v1573_v39 = vpop.xlane.xlu1 %1572  ;;  %v1615_v35 = vpop.xlane.xlu0 %1614 }
 0x5b3   :  { %v1618_v48 = vmul.f32 0.03125, %v1573_v39  ;;  %v1632_v22 = vmul.f32 0.03125, %v1615_v35  ;;  %v1649_v60 = vmul.f32 %v3892_v3, %v3892_v3  ;;  %v1663_v16 = vmul.f32 %v3895_v50, %v3895_v50 }
 0x5b5   :  { %v3903_v62 = vsub.f32 %v3805_v61, %v1618_v48  ;;  %v3906_v5 = vsub.f32 %v3808_v9, %v1632_v22  ;;  %v1665_v42 = vsel %vm348_vm0, %v1649_v60, 0.0  ;;  %v1707_v63 = vsel %vm348_vm0, %v1663_v16, 0.0  ;;  %v1841_v9 = vld [vmem:[%s4040_s13 + $0x10] sm:$0xff] }
 0x5b6   :  { %1666 = vadd.xlane.f32.xlu1 %v1665_v42  ;;  %1708 = vadd.xlane.f32.xlu0 %v1707_v63  ;;  %v2755_v38 = vpack.c.bf16 %v1842_v36, %v1841_v9 }
 0x5b7   :  { %v1650_v27 = vmul.f32 %v3903_v62, %v3903_v62  ;;  %v1664_v43 = vmul.f32 %v3906_v5, %v3906_v5 }
 0x5b8   :  { %2760 = vmatprep.subr.bf16.mxu1 %v2755_v38  ;;  %2756 = vmatprep.subr.bf16.mxu0 %v2755_v38 }
 0x5b9   :  { %v1668_v54 = vsel %vm348_vm0, %v1650_v27, 0.0  ;;  %v1710_v61 = vsel %vm348_vm0, %v1664_v43, 0.0  ;;  %2762 = vmatpush3.bf16.msra.mxu1 %v2755_v38  ;;  %2758 = vmatpush3.bf16.msra.mxu0 %v2755_v38 }
 0x5ba   :  { %1669 = vadd.xlane.f32.xlu1 %v1668_v54  ;;  %1711 = vadd.xlane.f32.xlu0 %v1710_v61 }
 0x62a   :  { %v1676_v1 = vpop.xlane.xlu0 %1675 }
 0x62b   :  { %v1716_v55 = vmul.f32 0.03125, %v1676_v1  ;;  %v1673_v58 = vpop.xlane.xlu1 %1672 }
 0x62c   :  { %v1715_v25 = vmul.f32 0.03125, %v1673_v58 }
 0x62d   :  { %v1732_v51 = vadd.f32 1e-05, %v1716_v55 }
 0x62e   :  { %v1731_v46 = vadd.f32 1e-05, %v1715_v25  ;;  %v1682_v53 = vpop.xlane.xlu0 %1681 }
 0x62f   :  { %2817 = vrsqrt.f32 %v1732_v51  ;;  %v1718_v45 = vmul.f32 0.03125, %v1682_v53  ;;  %v1679_v2 = vpop.xlane.xlu1 %1678 }
 0x630   :  { %2819 = vrsqrt.f32 %v1731_v46  ;;  %v1717_v56 = vmul.f32 0.03125, %v1679_v2 }
 0x631   :  { %v1734_v7 = vadd.f32 1e-05, %v1718_v45 }
 0x632   :  { %v1733_v30 = vadd.f32 1e-05, %v1717_v56  ;;  %v1688_v59 = vpop.xlane.xlu0 %1687 }
 0x633   :  { %2821 = vrsqrt.f32 %v1734_v7  ;;  %v1720_v44 = vmul.f32 0.03125, %v1688_v59  ;;  %v1685_v41 = vpop.xlane.xlu1 %1684 }
 0x634   :  { %2823 = vrsqrt.f32 %v1733_v30  ;;  %v1719_v8 = vmul.f32 0.03125, %v1685_v41 }
 0x635   :  { %v1736_v37 = vadd.f32 1e-05, %v1720_v44 }
 0x636   :  { %v1735_v12 = vadd.f32 1e-05, %v1719_v8  ;;  %v1694_v6 = vpop.xlane.xlu0 %1693 }
 0x637   :  { %2825 = vrsqrt.f32 %v1736_v37  ;;  %v1722_v20 = vmul.f32 0.03125, %v1694_v6  ;;  %v1691_v52 = vpop.xlane.xlu1 %1690 }
 0x638   :  { %2827 = vrsqrt.f32 %v1735_v12  ;;  %v1721_v31 = vmul.f32 0.03125, %v1691_v52 }
 0x639   :  { %v2818_v49 = vpop.eup %2817  ;;  %v1738_v11 = vadd.f32 1e-05, %v1722_v20 }
 0x63a   :  { %v2820_v0 = vpop.eup %2819  ;;  %v1764_v13 = vmul.f32 %v2818_v49, %v3821_v17  ;;  %v1737_v10 = vadd.f32 1e-05, %v1721_v31  ;;  %v1700_v28 = vpop.xlane.xlu0 %1699 }
 0x63b   :  { %2829 = vrsqrt.f32 %v1738_v11  ;;  %v1724_v57 = vmul.f32 0.03125, %v1700_v28  ;;  %v1697_v19 = vpop.xlane.xlu1 %1696  ;;  %v1763_v14 = vmul.f32 %v2820_v0, %v3824_v15 }
 0x63c   :  { %v1787_v39 = vmul.f32 %v3925_v47, %v1764_v13  ;;  %2831 = vrsqrt.f32 %v1737_v10  ;;  %v1723_v35 = vmul.f32 0.03125, %v1697_v19 }
 0x63d   :  { %v2822_v48 = vpop.eup %2821  ;;  %v1740_v22 = vadd.f32 1e-05, %v1724_v57  ;;  %v1786_v17 = vmul.f32 %v3925_v47, %v1763_v14 }
 0x63e   :  { %v2824_v60 = vpop.eup %2823  ;;  %v1810_v16 = vadd.f32 %v3931_v18, %v1787_v39  ;;  %v1739_v42 = vadd.f32 1e-05, %v1723_v35  ;;  %v1706_v63 = vpop.xlane.xlu0 %1705  ;;  %v1766_v27 = vmul.f32 %v2822_v48, %v3831_v33 }
 0x63f   :  { %2833 = vrsqrt.f32 %v1740_v22  ;;  %v1726_v43 = vmul.f32 0.03125, %v1706_v63  ;;  %v1703_v54 = vpop.xlane.xlu1 %1702  ;;  %v1809_v15 = vadd.f32 %v3931_v18, %v1786_v17  ;;  %v1765_v61 = vmul.f32 %v2824_v60, %v3835_v29 }
 0x640   :  { %2835 = vrsqrt.f32 %v1739_v42  ;;  %v1725_v9 = vmul.f32 0.03125, %v1703_v54  ;;  %v1789_v36 = vmul.f32 %v3925_v47, %v1766_v27  ;;  %v1826_v51 = vmax.f32 %v1810_v16, 0.0 }
 0x641   :  { %v2826_v38 = vpop.eup %2825  ;;  %v1742_v1 = vadd.f32 1e-05, %v1726_v43  ;;  %v1825_v55 = vmax.f32 %v1809_v15, 0.0  ;;  %v1788_v58 = vmul.f32 %v3925_v47, %v1765_v61 }
 0x642   :  { %v2828_v25 = vpop.eup %2827  ;;  %v1741_v46 = vadd.f32 1e-05, %v1725_v9  ;;  %v1812_v33 = vadd.f32 %v3931_v18, %v1789_v36  ;;  %v1768_v53 = vmul.f32 %v2826_v38, %v3843_v21 }
 0x643   :  { %2837 = vrsqrt.f32 %v1742_v1  ;;  %2618 = vmatprep.mubr.msk.f32.mxu1 %vm348_vm0, %v1825_v55  ;;  %v1667_v29 = vpop.xlane.xlu1 %1666  ;;  %v1709_v45 = vpop.xlane.xlu0 %1708  ;;  %v1811_v2 = vadd.f32 %v3931_v18, %v1788_v58  ;;  %v1767_v56 = vmul.f32 %v2828_v25, %v3847_v34 }
 0x644   :  { %2839 = vrsqrt.f32 %v1741_v46  ;;  %v1713_v7 = vmul.f32 0.03125, %v1667_v29  ;;  %v1727_v30 = vmul.f32 0.03125, %v1709_v45  ;;  %2619 = vmatmul.mubr.msk.f32.vlgmr.msra.gmra.mrb[32].mxu1 %vm348_vm0, %v1826_v51  ;;  %v1791_v21 = vmul.f32 %v3925_v47, %v1768_v53 }
 0x645   :  { %v2830_v59 = vpop.eup %2829  ;;  %v1827_v44 = vmax.f32 %v1811_v2, 0.0  ;;  %v1790_v41 = vmul.f32 %v3925_v47, %v1767_v56  ;;  %v1828_v6 = vmax.f32 %v1812_v33, 0.0 }
 0x646   :  { %v2832_v8 = vpop.eup %2831  ;;  %v1729_v37 = vadd.f32 1e-05, %v1713_v7  ;;  %v1743_v12 = vadd.f32 1e-05, %v1727_v30  ;;  %v1770_v20 = vmul.f32 %v2830_v59, %v3855_v26  ;;  %v1814_v49 = vadd.f32 %v3931_v18, %v1791_v21 }
 0x647   :  { %v1670_v52 = vpop.xlane.xlu1 %1669  ;;  %2621 = vmatprep.mubr.msk.f32.mxu1 %vm348_vm0, %v1827_v44  ;;  %v1712_v34 = vpop.xlane.xlu0 %1711  ;;  %v1813_v31 = vadd.f32 %v3931_v18, %v1790_v41  ;;  %v1769_v11 = vmul.f32 %v2832_v8, %v3859_v4  ;;  %v2162_v8 = vld [vmem:[%s4041_s14] ss:$0 sm:$0xff]  ;;  %s2889_s14 = smov [#allocation2]  }
 0x648   :  { %2841 = vrsqrt.f32 %v1729_v37  ;;  %v1714_v0 = vmul.f32 0.03125, %v1670_v52  ;;  %v1728_v13 = vmul.f32 0.03125, %v1712_v34  ;;  %2622 = vmatmul.mubr.msk.f32.gmra.mrb[34].mxu1 %vm348_vm0, %v1828_v6  ;;  %v1793_v10 = vmul.f32 %v3925_v47, %v1770_v20  ;;  %s2081_s24 = sshll.u32 %s2889_s14, 4  ;;  %s2082_s24 = int_to_ptr.vmem [resolvable:$true] %s2081_s24 }
 0x649   :  { %v2834_v28 = vpop.eup %2833  ;;  %2843 = vrsqrt.f32 %v1743_v12  ;;  %v1829_v26 = vmax.f32 %v1813_v31, 0.0  ;;  %v1830_v57 = vmax.f32 %v1814_v49, 0.0  ;;  %v1792_v19 = vmul.f32 %v3925_v47, %v1769_v11  ;;  %s2864_s1 = scalar_lea.vmem %s2082_s24, 2048  ;;  %p2869_p1 = scmp.lt.s32.totalorder %s2082_s24, %s2082_s24 }
 0x64a   :  { %v2836_v14 = vpop.eup %2835  ;;  %v1730_v39 = vadd.f32 1e-05, %v1714_v0  ;;  %v1744_v35 = vadd.f32 1e-05, %v1728_v13  ;;  %v1816_v48 = vadd.f32 %v3931_v18, %v1793_v10  ;;  %v1772_v4 = vmul.f32 %v2834_v28, %v3867_v23  ;;  %p2865_p0 = scmp.ne.s32.totalorder %s2082_s24, %s2864_s1  ;;  %p2870_p2 = scmp.lt.s32.totalorder %s2864_s1, %s2864_s1 }
 0x64b   :  { %2624 = vmatprep.mubr.msk.f32.mxu1 %vm348_vm0, %v1829_v26  ;;  %v1815_v22 = vadd.f32 %v3931_v18, %v1792_v19  ;;  %v1771_v17 = vmul.f32 %v2836_v14, %v3871_v24 }
 0x64c   :  { %2845 = vrsqrt.f32 %v1730_v39  ;;  %2625 = vmatmul.mubr.msk.f32.gmra.mrb[36].mxu1 %vm348_vm0, %v1830_v57  ;;  %v1795_v60 = vmul.f32 %v3925_v47, %v1772_v4  ;;  %v1832_v43 = vmax.f32 %v1816_v48, 0.0  ;;  %p2871_p3 = por %p2870_p2, %p2869_p1 }
 0x64d   :  { %v2838_v16 = vpop.eup %2837  ;;  %2847 = vrsqrt.f32 %v1744_v35  ;;  %v1831_v42 = vmax.f32 %v1815_v22, 0.0  ;;  %v1794_v63 = vmul.f32 %v3925_v47, %v1771_v17 }
 0x64e   :  { %v2840_v27 = vpop.eup %2839  ;;  %v1818_v23 = vadd.f32 %v3931_v18, %v1795_v60  ;;  %v1774_v54 = vmul.f32 %v2838_v16, %v3879_v32  ;;  %p2872_p4 = pnand %p2871_p3, %p2865_p0 }
 0x64f   :  { %2627 = vmatprep.mubr.msk.f32.mxu1 %vm348_vm0, %v1831_v42  ;;  %v1817_v24 = vadd.f32 %v3931_v18, %v1794_v63  ;;  %v1773_v15 = vmul.f32 %v2840_v27, %v3883_v40 }
 0x650   :  { %2628 = vmatmul.mubr.msk.f32.gmra.mrb[38].mxu1 %vm348_vm0, %v1832_v43  ;;  %v1797_v61 = vmul.f32 %v3925_v47, %v1774_v54  ;;  %v1834_v1 = vmax.f32 %v1818_v23, 0.0 }
 0x651   :  { %v1833_v9 = vmax.f32 %v1817_v24, 0.0  ;;  %v1796_v36 = vmul.f32 %v3925_v47, %v1773_v15 }
 0x652   :  { %v2842_v38 = vpop.eup %2841  ;;  %v1820_v55 = vadd.f32 %v3931_v18, %v1797_v61 }
 0x653   :  { %v2844_v58 = vpop.eup %2843  ;;  %2630 = vmatprep.mubr.msk.f32.mxu1 %vm348_vm0, %v1833_v9  ;;  %v1819_v32 = vadd.f32 %v3931_v18, %v1796_v36  ;;  %v1761_v25 = vmul.f32 %v2842_v38, %v3892_v3 }
 0x654   :  { %2631 = vmatmul.mubr.msk.f32.gmra.mrb[40].mxu1 %vm348_vm0, %v1834_v1  ;;  %v1775_v40 = vmul.f32 %v2844_v58, %v3895_v50  ;;  %v1836_v53 = vmax.f32 %v1820_v55, 0.0 }
 0x655   :  { %v1835_v51 = vmax.f32 %v1819_v32, 0.0  ;;  %v1784_v46 = vmul.f32 %v3925_v47, %v1761_v25 }
 0x656   :  { %v2846_v33 = vpop.eup %2845  ;;  %v1798_v29 = vmul.f32 %v3925_v47, %v1775_v40 }
 0x657   :  { %v2848_v45 = vpop.eup %2847  ;;  %v1762_v2 = vmul.f32 %v2846_v33, %v3903_v62  ;;  %2633 = vmatprep.mubr.msk.f32.mxu1 %vm348_vm0, %v1835_v51  ;;  %v1807_v56 = vadd.f32 %v3931_v18, %v1784_v46 }
 0x658   :  { %v1776_v3 = vmul.f32 %v2848_v45, %v3906_v5  ;;  %2634 = vmatmul.mubr.msk.f32.gmra.mrb[42].mxu1 %vm348_vm0, %v1836_v53  ;;  %v1821_v50 = vadd.f32 %v3931_v18, %v1798_v29 }
 0x659   :  { %v1785_v7 = vmul.f32 %v3925_v47, %v1762_v2  ;;  %v1823_v30 = vmax.f32 %v1807_v56, 0.0 }
 0x65a   :  { %v1837_v59 = vmax.f32 %v1821_v50, 0.0  ;;  %v1799_v44 = vmul.f32 %v3925_v47, %v1776_v3 }
 0x65b   :  { %v1808_v41 = vadd.f32 %v3931_v18, %v1785_v7  ;;  %2615 = vmatprep.mubr.msk.f32.mxu0 %vm348_vm0, %v1823_v30 }
 0x65c   :  { %2636 = vmatprep.mubr.msk.f32.mxu1 %vm348_vm0, %v1837_v59  ;;  %v1822_v62 = vadd.f32 %v3931_v18, %v1799_v44 }
 0x65d   :  { %v1824_v21 = vmax.f32 %v1808_v41, 0.0 }
 0x65e   :  { %v1838_v5 = vmax.f32 %v1822_v62, 0.0 }
 0x65f   :  { %2616 = vmatmul.mubr.msk.f32.vlgmr.msra.gmra.mrb[48].mxu0 %vm348_vm0, %v1824_v21 }
 0x660   :  { %2637 = vmatmul.mubr.msk.f32.gmra.mrb[44].mxu1 %vm348_vm0, %v1838_v5 }
 0x717   :  { %v2620_v37 = vpop.f32.mrb[32].mxu1 }
 0x718   :  { %v1980_v47 = vadd.f32 %v2620_v37, %v2162_v8  ;;  %v1974_v12 = vpop.f32.mrb[33].mxu1 }
 0x719   :  { %v1975_v6 = vadd.f32 %v2162_v8, %v1974_v12 }
 0x71a   :  { %v2047_v20 = vsel %vm2043_vm2, %v1980_v47, 0.0 }
 0x71b   :  { %2063 = vst [vmem:[#allocation2 + $0x18] sm:$0xff] %v2047_v20  ;;  %v2046_v18 = vsel %vm2043_vm2, %v1975_v6, 0.0  ;;  %v2623_v52 = vpop.f32.mrb[34].mxu1 }
 0x71c   :  { %2062 = vst [vmem:[#allocation2 + $0x10] sm:$0xff] %v2046_v18  ;;  %v1990_v34 = vadd.f32 %v2623_v52, %v2162_v8  ;;  %v1984_v31 = vpop.f32.mrb[35].mxu1 }
 0x71d   :  { %v1985_v49 = vadd.f32 %v2162_v8, %v1984_v31 }
 0x71e   :  { %v2049_v11 = vsel %vm2043_vm2, %v1990_v34, 0.0 }
 0x71f   :  { %2065 = vst [vmem:[#allocation2 + $0x28] sm:$0xff] %v2049_v11  ;;  %v2048_v0 = vsel %vm2043_vm2, %v1985_v49, 0.0  ;;  %v2626_v13 = vpop.f32.mrb[36].mxu1 }
 0x720   :  { %2064 = vst [vmem:[#allocation2 + $0x20] sm:$0xff] %v2048_v0  ;;  %v2000_v10 = vadd.f32 %v2626_v13, %v2162_v8  ;;  %v1994_v28 = vpop.f32.mrb[37].mxu1 }
 0x721   :  { %v1995_v26 = vadd.f32 %v2162_v8, %v1994_v28 }
 0x722   :  { %v2051_v57 = vsel %vm2043_vm2, %v2000_v10, 0.0 }
 0x723   :  { %2067 = vst [vmem:[#allocation2 + $0x38] sm:$0xff] %v2051_v57  ;;  %v2050_v19 = vsel %vm2043_vm2, %v1995_v26, 0.0  ;;  %v2629_v14 = vpop.f32.mrb[38].mxu1 }
 0x724   :  { %2066 = vst [vmem:[#allocation2 + $0x30] sm:$0xff] %v2050_v19  ;;  %v2010_v39 = vadd.f32 %v2629_v14, %v2162_v8  ;;  %v2004_v35 = vpop.f32.mrb[39].mxu1 }
 0x725   :  { %v2005_v48 = vadd.f32 %v2162_v8, %v2004_v35 }
 0x726   :  { %v2053_v4 = vsel %vm2043_vm2, %v2010_v39, 0.0 }
 0x727   :  { %2069 = vst [vmem:[#allocation2 + $0x48] sm:$0xff] %v2053_v4  ;;  %v2052_v22 = vsel %vm2043_vm2, %v2005_v48, 0.0  ;;  %v2632_v17 = vpop.f32.mrb[40].mxu1 }
 0x728   :  { %2068 = vst [vmem:[#allocation2 + $0x40] sm:$0xff] %v2052_v22  ;;  %v2020_v60 = vadd.f32 %v2632_v17, %v2162_v8  ;;  %v2014_v16 = vpop.f32.mrb[41].mxu1 }
 0x729   :  { %v2015_v42 = vadd.f32 %v2162_v8, %v2014_v16 }
 0x72a   :  { %v2055_v63 = vsel %vm2043_vm2, %v2020_v60, 0.0 }
 0x72b   :  { %2071 = vst [vmem:[#allocation2 + $0x58] sm:$0xff] %v2055_v63  ;;  %v2054_v27 = vsel %vm2043_vm2, %v2015_v42, 0.0  ;;  %v2635_v43 = vpop.f32.mrb[42].mxu1 }
 0x72c   :  { %2070 = vst [vmem:[#allocation2 + $0x50] sm:$0xff] %v2054_v27  ;;  %v2030_v23 = vadd.f32 %v2635_v43, %v2162_v8  ;;  %v2024_v54 = vpop.f32.mrb[43].mxu1 }
 0x72d   :  { %v2025_v24 = vadd.f32 %v2162_v8, %v2024_v54 }
 0x72e   :  { %v2057_v15 = vsel %vm2043_vm2, %v2030_v23, 0.0 }
 0x72f   :  { %2073 = vst [vmem:[#allocation2 + $0x68] sm:$0xff] %v2057_v15  ;;  %v2056_v61 = vsel %vm2043_vm2, %v2025_v24, 0.0 }
 0x730   :  { %2072 = vst [vmem:[#allocation2 + $0x60] sm:$0xff] %v2056_v61 }
 0x732   :  { %v2617_v9 = vpop.f32.mrb[48].mxu0 }
 0x733   :  { %v1970_v36 = vadd.f32 %v2617_v9, %v2162_v8  ;;  %v2638_v38 = vpop.f32.mrb[44].mxu1  ;;  %v1964_v1 = vpop.f32.mrb[49].mxu0 }
 0x734   :  { %v2040_v55 = vadd.f32 %v2638_v38, %v2162_v8  ;;  %v1965_v58 = vadd.f32 %v2162_v8, %v1964_v1  ;;  %v2034_v32 = vpop.f32.mrb[45].mxu1 }
 0x735   :  { %v2045_v25 = vsel %vm2043_vm2, %v1970_v36, 0.0  ;;  %v2035_v40 = vadd.f32 %v2162_v8, %v2034_v32 }
 0x736   :  { %2061 = vst [vmem:[#allocation2 + $0x8] sm:$0xff] %v2045_v25  ;;  %v2059_v51 = vsel %vm2043_vm2, %v2040_v55, 0.0  ;;  %v2044_v46 = vsel %vm2043_vm2, %v1965_v58, 0.0 }
 0x737   :  { %2075 = vst [vmem:[#allocation2 + $0x78] sm:$0xff] %v2059_v51  ;;  %2060 = vst [vmem:[#allocation2] sm:$0xff] %v2044_v46  ;;  %v2058_v33 = vsel %vm2043_vm2, %v2035_v40, 0.0 }
 0x738   :  { %2074 = vst [vmem:[#allocation2 + $0x70] sm:$0xff] %v2058_v33 }
 0x739   :  { %2875 = shalt.err (!%p2872_p4)
}
 0x73a   :  { %s2876_s2 = scalar_lea.hbm %s4042_s15, 2048 }
 0x73b   :  { %p2877_p5 = scmp.ne.s32.totalorder %s4042_s15, %s2876_s2  ;;  %p2880_p6 = scmp.lt.u32.totalorder %s2876_s2, %s4042_s15 }
 0x73d   :  { %p2882_p7 = pnand %p2880_p6, %p2877_p5 }
 0x73f   :  { %2885 = shalt.err (!%p2882_p7)
}
 0x740   :  { %s2890_s4 = smov 128   ;;  %s2891_s30 = smov 8  }
 0x741   :  { %2087 = dma.vmem_to_hbm [thread:$0]  %s2082_s24, 2048, %s4042_s15, [#allocation3], %s2890_s4, %s2890_s4, %s2891_s30  }
 0x742   :  { %2886 = dma.done.wait [#allocation3], 2048  }
 0x743   :  { %2887 = vsyncadd [#allocation3], 4294965248 }
 0x744   :  { %2091 = vsyncpa [#allocation3], 1 }

</bundles_post_ra>
